<compile_context>
chip_gen: v5e
topology: v5e:2x2
jax: 0.10.0
libtpu: 0.0.40
codegen_flags: <defaults>
</compile_context>

<pallas_src>
import math

import numpy as np
import jax
import jax.numpy as jnp
from jax.experimental import pallas as pl
from jax.experimental.pallas import tpu as pltpu

# ----------------------------- configuration --------------------------------
INPUT_DIM = 16      # input feature dim
HIDDEN = 32         # hidden_size
SEQ_LEN = 8         # sequence length (before CLS prepend)
NUM_CLASSES = 5
NUM_HEADS = 4
HEAD_DIM = HIDDEN // NUM_HEADS
INTERMEDIATE = 64   # BERT FFN intermediate size
NUM_LAYERS = 2
LN_EPS = 1e-12      # BERT LayerNorm eps
OUT_PAD = 128       # lane-dense classifier output width (real logits in [:, :NUM_CLASSES])


# ------------------------------ kernel helpers -------------------------------
def _layer_norm(h, g, b):
    mean = jnp.mean(h, axis=-1, keepdims=True)
    var = jnp.mean(jnp.square(h - mean), axis=-1, keepdims=True)
    return (h - mean) * jax.lax.rsqrt(var + LN_EPS) * g + b


def _gelu_tanh(y):
    # TODO(synk): BERT uses exact erf-GELU; tanh approximation (EUP tanh) used in-kernel.
    c = math.sqrt(2.0 / math.pi)
    return 0.5 * y * (1.0 + jnp.tanh(c * (y + 0.044715 * y * y * y)))


# ------------------------------ fused kernel ---------------------------------
def _secbert_fwd_kernel(x_ref, add_ref, we_ref, eg_ref, eb_ref,
                        wqkv_ref, bqkv_ref, wo_ref, bo_ref,
                        ln1g_ref, ln1b_ref, w1_ref, b1_ref, w2_ref, b2_ref,
                        ln2g_ref, ln2b_ref, wout_ref, bout_ref, o_ref):
    """One grid step = one batch element.  Everything stays in VMEM/vregs."""
    x = x_ref[0]                                             # (T, Din); row 0 is zeros
    # embedding linear; `add_ref` already folds in emb bias (rows>0), CLS token (row 0),
    # sinusoidal PE, BERT position embeddings and token-type embedding.
    h = jnp.dot(x, we_ref[...], preferred_element_type=jnp.float32) + add_ref[...]
    h = _layer_norm(h, eg_ref[...], eb_ref[...])             # BertEmbeddings.LayerNorm

    T, H = h.shape
    dh = H // NUM_HEADS
    scale = 1.0 / math.sqrt(dh)

    # per-head lane masks (attention_mask is all-ones -> no sequence masking needed)
    lane = jax.lax.broadcasted_iota(jnp.int32, (1, H), 1)
    head_masks = [jnp.logical_and(lane >= i * dh, lane < (i + 1) * dh)
                  for i in range(NUM_HEADS)]

    for l in range(NUM_LAYERS):
        # Q/K/V projections (weights stacked per layer, no HBM traffic in between)
        q = jnp.dot(h, wqkv_ref[l, 0], preferred_element_type=jnp.float32) + bqkv_ref[l, 0]
        k = jnp.dot(h, wqkv_ref[l, 1], preferred_element_type=jnp.float32) + bqkv_ref[l, 1]
        v = jnp.dot(h, wqkv_ref[l, 2], preferred_element_type=jnp.float32) + bqkv_ref[l, 2]

        # multi-head attention via lane masking (avoids sub-vreg slices/reshapes):
        # masking q zeroes every non-head lane, so q_m @ k^T is exactly that head's scores;
        # masking v places that head's context back into its own lanes of the accumulator.
        ctx = jnp.zeros_like(h)                              # (T, H)
        for i in range(NUM_HEADS):
            qm = jnp.where(head_masks[i], q, 0.0)
            vm = jnp.where(head_masks[i], v, 0.0)
            s = jax.lax.dot_general(qm, k, (((1,), (1,)), ((), ())),
                                    preferred_element_type=jnp.float32) * scale  # (T, T)
            s = s - jnp.max(s, axis=-1, keepdims=True)
            p = jnp.exp(s)
            p = p * pl.reciprocal(jnp.sum(p, axis=-1, keepdims=True), approx=True)
            ctx = ctx + jnp.dot(p, vm, preferred_element_type=jnp.float32)

        attn_out = jnp.dot(ctx, wo_ref[l], preferred_element_type=jnp.float32) + bo_ref[l]
        h = _layer_norm(h + attn_out, ln1g_ref[l], ln1b_ref[l])

        ffn = jnp.dot(h, w1_ref[l], preferred_element_type=jnp.float32) + b1_ref[l]
        ffn = _gelu_tanh(ffn)
        ffn = jnp.dot(ffn, w2_ref[l], preferred_element_type=jnp.float32) + b2_ref[l]
        h = _layer_norm(h + ffn, ln2g_ref[l], ln2b_ref[l])

    # classifier on all rows (lane-dense 128-wide output, no sub-tile slicing in-kernel);
    # the wrapper keeps only row 0 (CLS) and the first NUM_CLASSES lanes.
    logits = jnp.dot(h, wout_ref[...], preferred_element_type=jnp.float32) + bout_ref[...]
    o_ref[0] = logits.astype(o_ref.dtype)                    # (T, OUT_PAD)


# ------------------------------- parameters ----------------------------------
def sinusoidal_pe(seq_len, hidden):
    position = np.arange(0, seq_len, dtype=np.float32)[:, None]
    div_term = np.exp(
        np.arange(0, hidden, 2, dtype=np.float32) * (-np.log(10000.0) / hidden)
    )
    pe = np.zeros((seq_len, hidden), np.float32)
    pe[:, 0::2] = np.sin(position * div_term)
    pe[:, 1::2] = np.cos(position * div_term)
    return jnp.asarray(pe[None])  # (1, seq_len, hidden)


def init_params(key):
    n_keys = 8 + NUM_LAYERS * 8
    keys = iter(jax.random.split(key, n_keys))
    std = 0.02

    def w(shape):
        return jax.random.normal(next(keys), shape, jnp.float32) * std

    def zeros(shape):
        return jnp.zeros(shape, jnp.float32)

    def ones(shape):
        return jnp.ones(shape, jnp.float32)

    T = SEQ_LEN + 1
    params = {
        "emb_w": w((INPUT_DIM, HIDDEN)),
        "emb_b": zeros((1, HIDDEN)),
        "cls_token": jax.random.truncated_normal(
            next(keys), -2.0, 2.0, (1, 1, HIDDEN), jnp.float32) * std,
        "pos_embedding": sinusoidal_pe(T, HIDDEN),          # sinusoidal buffer
        "bert_pos_emb": w((T, HIDDEN)),                     # BertEmbeddings.position_embeddings
        "bert_tok_emb": w((1, HIDDEN)),                     # token_type_embeddings[0]
        "emb_ln_g": ones((1, HIDDEN)),
        "emb_ln_b": zeros((1, HIDDEN)),
        "out_w": w((HIDDEN, NUM_CLASSES)),
        "out_b": zeros((1, NUM_CLASSES)),
        "layers": [],
    }
    for _ in range(NUM_LAYERS):
        params["layers"].append({
            "wq": w((HIDDEN, HIDDEN)), "bq": zeros((1, HIDDEN)),
            "wk": w((HIDDEN, HIDDEN)), "bk": zeros((1, HIDDEN)),
            "wv": w((HIDDEN, HIDDEN)), "bv": zeros((1, HIDDEN)),
            "wo": w((HIDDEN, HIDDEN)), "bo": zeros((1, HIDDEN)),
            "ln1_g": ones((1, HIDDEN)), "ln1_b": zeros((1, HIDDEN)),
            "w1": w((HIDDEN, INTERMEDIATE)), "b1": zeros((1, INTERMEDIATE)),
            "w2": w((INTERMEDIATE, HIDDEN)), "b2": zeros((1, HIDDEN)),
            "ln2_g": ones((1, HIDDEN)), "ln2_b": zeros((1, HIDDEN)),
        })
    return params


def pack_params(params):
    """One-time repacking of module parameters into kernel-friendly arrays."""
    T = SEQ_LEN + 1
    lyrs = params["layers"]

    # additive[t] is everything added to (x_pad @ We) before the embedding LayerNorm:
    #   rows > 0 : emb bias + sinusoidal PE + BERT position emb + token-type emb
    #   row 0    : CLS token + sinusoidal PE + BERT position emb + token-type emb
    pos_all = (params["pos_embedding"][0, :T]
               + params["bert_pos_emb"][:T]
               + params["bert_tok_emb"])                     # (T, H)
    additive = pos_all + params["emb_b"]
    additive = additive.at[0].set(pos_all[0] + params["cls_token"][0, 0])

    packed = {
        "additive": additive,                                # (T, H)
        "emb_w": params["emb_w"],                            # (Din, H)
        "emb_ln_g": params["emb_ln_g"],                      # (1, H)
        "emb_ln_b": params["emb_ln_b"],                      # (1, H)
        "wqkv": jnp.stack([jnp.stack([l["wq"], l["wk"], l["wv"]]) for l in lyrs]),  # (L,3,H,H)
        "bqkv": jnp.stack([jnp.stack([l["bq"], l["bk"], l["bv"]]) for l in lyrs]),  # (L,3,1,H)
        "wo": jnp.stack([l["wo"] for l in lyrs]),            # (L, H, H)
        "bo": jnp.stack([l["bo"] for l in lyrs]),            # (L, 1, H)
        "ln1_g": jnp.stack([l["ln1_g"] for l in lyrs]),      # (L, 1, H)
        "ln1_b": jnp.stack([l["ln1_b"] for l in lyrs]),
        "w1": jnp.stack([l["w1"] for l in lyrs]),            # (L, H, I)
        "b1": jnp.stack([l["b1"] for l in lyrs]),            # (L, 1, I)
        "w2": jnp.stack([l["w2"] for l in lyrs]),            # (L, I, H)
        "b2": jnp.stack([l["b2"] for l in lyrs]),            # (L, 1, H)
        "ln2_g": jnp.stack([l["ln2_g"] for l in lyrs]),
        "ln2_b": jnp.stack([l["ln2_b"] for l in lyrs]),
        # lane-dense (128-wide) classifier weights; columns >= NUM_CLASSES are zero.
        "out_w": jnp.zeros((HIDDEN, OUT_PAD), jnp.float32).at[:, :NUM_CLASSES].set(params["out_w"]),
        "out_b": jnp.zeros((1, OUT_PAD), jnp.float32).at[:, :NUM_CLASSES].set(params["out_b"]),
    }
    return packed


# -------------------------------- forward ------------------------------------
_WEIGHT_ORDER = ["additive", "emb_w", "emb_ln_g", "emb_ln_b",
                 "wqkv", "bqkv", "wo", "bo", "ln1_g", "ln1_b",
                 "w1", "b1", "w2", "b2", "ln2_g", "ln2_b",
                 "out_w", "out_b"]


def forward(packed, x):
    """x: (B, SEQ_LEN, INPUT_DIM) float32 -> logits (B, NUM_CLASSES)."""
    B, S, Din = x.shape
    T = S + 1

    # zero row prepended so the kernel's single embedding matmul also covers the CLS slot
    # (CLS token itself is folded into `additive[0]`).
    x_pad = jnp.concatenate([jnp.zeros((B, 1, Din), x.dtype), x], axis=1)  # (B, T, Din)

    weights = [packed[name] for name in _WEIGHT_ORDER]

    def full_spec(a):
        zeros = (0,) * a.ndim
        return pl.BlockSpec(a.shape, lambda b: zeros)        # VMEM-resident, grid-invariant

    out = pl.pallas_call(
        _secbert_fwd_kernel,
        out_shape=jax.ShapeDtypeStruct((B, T, OUT_PAD), jnp.float32),
        grid=(B,),
        in_specs=[pl.BlockSpec((1, T, Din), lambda b: (b, 0, 0))]
                 + [full_spec(w) for w in weights],
        out_specs=pl.BlockSpec((1, T, OUT_PAD), lambda b: (b, 0, 0)),
        compiler_params=pltpu.CompilerParams(
            dimension_semantics=("parallel",)),              # batch across TCs on v7x
    )(x_pad, *weights)

    return out[:, 0, :NUM_CLASSES]                           # CLS row, real classes only


# --------------------------------- main ---------------------------------------
if __name__ == "__main__":
    key = jax.random.PRNGKey(0)
    pkey, xkey = jax.random.split(key)
    params = init_params(pkey)
    packed = pack_params(params)
    x = jax.random.normal(xkey, (2, SEQ_LEN, INPUT_DIM), jnp.float32)

    logits = jax.jit(forward)(packed, x)
    logits = jax.block_until_ready(logits)

    assert logits.shape == (2, NUM_CLASSES)
    assert bool(jnp.all(jnp.isfinite(logits)))
    print("KERNEL_OK")
</pallas_src>

<mosaic_0001>
module attributes {stable_mosaic.version = 11 : i64} {
  func.func @_secbert_fwd_kernel(%arg0: i32, %arg1: memref<1x9x16xf32, #tpu.memory_space<vmem>>, %arg2: memref<9x32xf32, #tpu.memory_space<vmem>>, %arg3: memref<16x32xf32, #tpu.memory_space<vmem>>, %arg4: memref<1x32xf32, #tpu.memory_space<vmem>>, %arg5: memref<1x32xf32, #tpu.memory_space<vmem>>, %arg6: memref<2x3x32x32xf32, #tpu.memory_space<vmem>>, %arg7: memref<2x3x1x32xf32, #tpu.memory_space<vmem>>, %arg8: memref<2x32x32xf32, #tpu.memory_space<vmem>>, %arg9: memref<2x1x32xf32, #tpu.memory_space<vmem>>, %arg10: memref<2x1x32xf32, #tpu.memory_space<vmem>>, %arg11: memref<2x1x32xf32, #tpu.memory_space<vmem>>, %arg12: memref<2x32x64xf32, #tpu.memory_space<vmem>>, %arg13: memref<2x1x64xf32, #tpu.memory_space<vmem>>, %arg14: memref<2x64x32xf32, #tpu.memory_space<vmem>>, %arg15: memref<2x1x32xf32, #tpu.memory_space<vmem>>, %arg16: memref<2x1x32xf32, #tpu.memory_space<vmem>>, %arg17: memref<2x1x32xf32, #tpu.memory_space<vmem>>, %arg18: memref<32x128xf32, #tpu.memory_space<vmem>>, %arg19: memref<1x128xf32, #tpu.memory_space<vmem>>, %arg20: memref<1x9x128xf32, #tpu.memory_space<vmem>>) attributes {dimension_semantics = [#tpu.dimension_semantics<parallel>], iteration_bounds = array<i64: 2>, scalar_prefetch = 0 : i64, scratch_operands = 0 : i64, tpu.core_type = #tpu.core_type<tc>, window_params = [{transform_indices = @transform_0, window_bounds = array<i64: 1, 9, 16>}, {pipeline_mode = #tpu.pipeline_mode<synchronous>, transform_indices = @transform_1, window_bounds = array<i64: 9, 32>}, {pipeline_mode = #tpu.pipeline_mode<synchronous>, transform_indices = @transform_2, window_bounds = array<i64: 16, 32>}, {pipeline_mode = #tpu.pipeline_mode<synchronous>, transform_indices = @transform_3, window_bounds = array<i64: 1, 32>}, {pipeline_mode = #tpu.pipeline_mode<synchronous>, transform_indices = @transform_4, window_bounds = array<i64: 1, 32>}, {pipeline_mode = #tpu.pipeline_mode<synchronous>, transform_indices = @transform_5, window_bounds = array<i64: 2, 3, 32, 32>}, {pipeline_mode = #tpu.pipeline_mode<synchronous>, transform_indices = @transform_6, window_bounds = array<i64: 2, 3, 1, 32>}, {pipeline_mode = #tpu.pipeline_mode<synchronous>, transform_indices = @transform_7, window_bounds = array<i64: 2, 32, 32>}, {pipeline_mode = #tpu.pipeline_mode<synchronous>, transform_indices = @transform_8, window_bounds = array<i64: 2, 1, 32>}, {pipeline_mode = #tpu.pipeline_mode<synchronous>, transform_indices = @transform_9, window_bounds = array<i64: 2, 1, 32>}, {pipeline_mode = #tpu.pipeline_mode<synchronous>, transform_indices = @transform_10, window_bounds = array<i64: 2, 1, 32>}, {pipeline_mode = #tpu.pipeline_mode<synchronous>, transform_indices = @transform_11, window_bounds = array<i64: 2, 32, 64>}, {pipeline_mode = #tpu.pipeline_mode<synchronous>, transform_indices = @transform_12, window_bounds = array<i64: 2, 1, 64>}, {pipeline_mode = #tpu.pipeline_mode<synchronous>, transform_indices = @transform_13, window_bounds = array<i64: 2, 64, 32>}, {pipeline_mode = #tpu.pipeline_mode<synchronous>, transform_indices = @transform_14, window_bounds = array<i64: 2, 1, 32>}, {pipeline_mode = #tpu.pipeline_mode<synchronous>, transform_indices = @transform_15, window_bounds = array<i64: 2, 1, 32>}, {pipeline_mode = #tpu.pipeline_mode<synchronous>, transform_indices = @transform_16, window_bounds = array<i64: 2, 1, 32>}, {pipeline_mode = #tpu.pipeline_mode<synchronous>, transform_indices = @transform_17, window_bounds = array<i64: 32, 128>}, {pipeline_mode = #tpu.pipeline_mode<synchronous>, transform_indices = @transform_18, window_bounds = array<i64: 1, 128>}, {transform_indices = @transform_19, window_bounds = array<i64: 1, 9, 128>}]} {
    %c0 = arith.constant 0 : index
    %c0_0 = arith.constant 0 : index
    %c0_1 = arith.constant 0 : index
    %0 = vector.load %arg1[%c0, %c0_0, %c0_1] : memref<1x9x16xf32, #tpu.memory_space<vmem>>, vector<1x9x16xf32>
    %1 = vector.shape_cast %0 : vector<1x9x16xf32> to vector<9x16xf32>
    %c0_2 = arith.constant 0 : index
    %c0_3 = arith.constant 0 : index
    %2 = vector.load %arg3[%c0_2, %c0_3] : memref<16x32xf32, #tpu.memory_space<vmem>>, vector<16x32xf32>
    %cst = arith.constant dense<0.000000e+00> : vector<9x32xf32>
    %3 = tpu.matmul %1, %2, %cst {dimension_numbers = #tpu.dot_dimension_numbers<[1], [0], [0], [1], [0, 0, 1, 1], [], []>} : vector<9x16xf32>, vector<16x32xf32>, vector<9x32xf32> -> vector<9x32xf32>
    %c0_4 = arith.constant 0 : index
    %c0_5 = arith.constant 0 : index
    %4 = vector.load %arg2[%c0_4, %c0_5] : memref<9x32xf32, #tpu.memory_space<vmem>>, vector<9x32xf32>
    %5 = arith.addf %3, %4 : vector<9x32xf32>
    %c0_6 = arith.constant 0 : index
    %c0_7 = arith.constant 0 : index
    %6 = vector.load %arg4[%c0_6, %c0_7] : memref<1x32xf32, #tpu.memory_space<vmem>>, vector<1x32xf32>
    %c0_8 = arith.constant 0 : index
    %c0_9 = arith.constant 0 : index
    %7 = vector.load %arg5[%c0_8, %c0_9] : memref<1x32xf32, #tpu.memory_space<vmem>>, vector<1x32xf32>
    %cst_10 = arith.constant dense<0.000000e+00> : vector<9xf32>
    %8 = vector.multi_reduction <add>, %5, %cst_10 [1] : vector<9x32xf32> to vector<9xf32>
    %9 = vector.shape_cast %8 : vector<9xf32> to vector<9x1xf32>
    %cst_11 = arith.constant 3.200000e+01 : f32
    %10 = vector.broadcast %cst_11 : f32 to vector<9x1xf32>
    %11 = arith.divf %9, %10 : vector<9x1xf32>
    %12 = vector.broadcast %11 : vector<9x1xf32> to vector<9x32xf32>
    %13 = arith.subf %5, %12 : vector<9x32xf32>
    %14 = arith.mulf %13, %13 : vector<9x32xf32>
    %cst_12 = arith.constant dense<0.000000e+00> : vector<9xf32>
    %15 = vector.multi_reduction <add>, %14, %cst_12 [1] : vector<9x32xf32> to vector<9xf32>
    %16 = vector.shape_cast %15 : vector<9xf32> to vector<9x1xf32>
    %cst_13 = arith.constant 3.200000e+01 : f32
    %17 = vector.broadcast %cst_13 : f32 to vector<9x1xf32>
    %18 = arith.divf %16, %17 : vector<9x1xf32>
    %19 = vector.broadcast %11 : vector<9x1xf32> to vector<9x32xf32>
    %20 = arith.subf %5, %19 : vector<9x32xf32>
    %cst_14 = arith.constant 9.99999996E-13 : f32
    %21 = vector.broadcast %cst_14 : f32 to vector<9x1xf32>
    %22 = arith.addf %18, %21 : vector<9x1xf32>
    %23 = math.rsqrt %22 : vector<9x1xf32>
    %24 = vector.broadcast %23 : vector<9x1xf32> to vector<9x32xf32>
    %25 = arith.mulf %20, %24 : vector<9x32xf32>
    %26 = vector.broadcast %6 : vector<1x32xf32> to vector<9x32xf32>
    %27 = arith.mulf %25, %26 : vector<9x32xf32>
    %28 = vector.broadcast %7 : vector<1x32xf32> to vector<9x32xf32>
    %29 = arith.addf %27, %28 : vector<9x32xf32>
    %30 = tpu.iota {dimensions = array<i32: 1>} : vector<1x32xi32>
    %c0_i32 = arith.constant 0 : i32
    %31 = vector.broadcast %c0_i32 : i32 to vector<1x32xi32>
    %32 = arith.cmpi sge, %30, %31 : vector<1x32xi32>
    %c8_i32 = arith.constant 8 : i32
    %33 = vector.broadcast %c8_i32 : i32 to vector<1x32xi32>
    %34 = arith.cmpi slt, %30, %33 : vector<1x32xi32>
    %35 = arith.andi %32, %34 : vector<1x32xi1>
    %c8_i32_15 = arith.constant 8 : i32
    %36 = vector.broadcast %c8_i32_15 : i32 to vector<1x32xi32>
    %37 = arith.cmpi sge, %30, %36 : vector<1x32xi32>
    %c16_i32 = arith.constant 16 : i32
    %38 = vector.broadcast %c16_i32 : i32 to vector<1x32xi32>
    %39 = arith.cmpi slt, %30, %38 : vector<1x32xi32>
    %40 = arith.andi %37, %39 : vector<1x32xi1>
    %c16_i32_16 = arith.constant 16 : i32
    %41 = vector.broadcast %c16_i32_16 : i32 to vector<1x32xi32>
    %42 = arith.cmpi sge, %30, %41 : vector<1x32xi32>
    %c24_i32 = arith.constant 24 : i32
    %43 = vector.broadcast %c24_i32 : i32 to vector<1x32xi32>
    %44 = arith.cmpi slt, %30, %43 : vector<1x32xi32>
    %45 = arith.andi %42, %44 : vector<1x32xi1>
    %c24_i32_17 = arith.constant 24 : i32
    %46 = vector.broadcast %c24_i32_17 : i32 to vector<1x32xi32>
    %47 = arith.cmpi sge, %30, %46 : vector<1x32xi32>
    %c32_i32 = arith.constant 32 : i32
    %48 = vector.broadcast %c32_i32 : i32 to vector<1x32xi32>
    %49 = arith.cmpi slt, %30, %48 : vector<1x32xi32>
    %50 = arith.andi %47, %49 : vector<1x32xi1>
    %c0_18 = arith.constant 0 : index
    %c0_19 = arith.constant 0 : index
    %c0_20 = arith.constant 0 : index
    %c0_21 = arith.constant 0 : index
    %51 = vector.load %arg6[%c0_18, %c0_19, %c0_20, %c0_21] : memref<2x3x32x32xf32, #tpu.memory_space<vmem>>, vector<1x1x32x32xf32>
    %52 = vector.shape_cast %51 : vector<1x1x32x32xf32> to vector<32x32xf32>
    %cst_22 = arith.constant dense<0.000000e+00> : vector<9x32xf32>
    %53 = tpu.matmul %29, %52, %cst_22 {dimension_numbers = #tpu.dot_dimension_numbers<[1], [0], [0], [1], [0, 0, 1, 1], [], []>} : vector<9x32xf32>, vector<32x32xf32>, vector<9x32xf32> -> vector<9x32xf32>
    %c0_23 = arith.constant 0 : index
    %c0_24 = arith.constant 0 : index
    %c0_25 = arith.constant 0 : index
    %c0_26 = arith.constant 0 : index
    %54 = vector.load %arg7[%c0_23, %c0_24, %c0_25, %c0_26] : memref<2x3x1x32xf32, #tpu.memory_space<vmem>>, vector<1x1x1x32xf32>
    %55 = vector.shape_cast %54 : vector<1x1x1x32xf32> to vector<1x32xf32>
    %56 = vector.broadcast %55 : vector<1x32xf32> to vector<9x32xf32>
    %57 = arith.addf %53, %56 : vector<9x32xf32>
    %c0_27 = arith.constant 0 : index
    %c1 = arith.constant 1 : index
    %c0_28 = arith.constant 0 : index
    %c0_29 = arith.constant 0 : index
    %58 = vector.load %arg6[%c0_27, %c1, %c0_28, %c0_29] : memref<2x3x32x32xf32, #tpu.memory_space<vmem>>, vector<1x1x32x32xf32>
    %59 = vector.shape_cast %58 : vector<1x1x32x32xf32> to vector<32x32xf32>
    %cst_30 = arith.constant dense<0.000000e+00> : vector<9x32xf32>
    %60 = tpu.matmul %29, %59, %cst_30 {dimension_numbers = #tpu.dot_dimension_numbers<[1], [0], [0], [1], [0, 0, 1, 1], [], []>} : vector<9x32xf32>, vector<32x32xf32>, vector<9x32xf32> -> vector<9x32xf32>
    %c0_31 = arith.constant 0 : index
    %c1_32 = arith.constant 1 : index
    %c0_33 = arith.constant 0 : index
    %c0_34 = arith.constant 0 : index
    %61 = vector.load %arg7[%c0_31, %c1_32, %c0_33, %c0_34] : memref<2x3x1x32xf32, #tpu.memory_space<vmem>>, vector<1x1x1x32xf32>
    %62 = vector.shape_cast %61 : vector<1x1x1x32xf32> to vector<1x32xf32>
    %63 = vector.broadcast %62 : vector<1x32xf32> to vector<9x32xf32>
    %64 = arith.addf %60, %63 : vector<9x32xf32>
    %c0_35 = arith.constant 0 : index
    %c2 = arith.constant 2 : index
    %c0_36 = arith.constant 0 : index
    %c0_37 = arith.constant 0 : index
    %65 = vector.load %arg6[%c0_35, %c2, %c0_36, %c0_37] : memref<2x3x32x32xf32, #tpu.memory_space<vmem>>, vector<1x1x32x32xf32>
    %66 = vector.shape_cast %65 : vector<1x1x32x32xf32> to vector<32x32xf32>
    %cst_38 = arith.constant dense<0.000000e+00> : vector<9x32xf32>
    %67 = tpu.matmul %29, %66, %cst_38 {dimension_numbers = #tpu.dot_dimension_numbers<[1], [0], [0], [1], [0, 0, 1, 1], [], []>} : vector<9x32xf32>, vector<32x32xf32>, vector<9x32xf32> -> vector<9x32xf32>
    %c0_39 = arith.constant 0 : index
    %c2_40 = arith.constant 2 : index
    %c0_41 = arith.constant 0 : index
    %c0_42 = arith.constant 0 : index
    %68 = vector.load %arg7[%c0_39, %c2_40, %c0_41, %c0_42] : memref<2x3x1x32xf32, #tpu.memory_space<vmem>>, vector<1x1x1x32xf32>
    %69 = vector.shape_cast %68 : vector<1x1x1x32xf32> to vector<1x32xf32>
    %70 = vector.broadcast %69 : vector<1x32xf32> to vector<9x32xf32>
    %71 = arith.addf %67, %70 : vector<9x32xf32>
    %cst_43 = arith.constant 0.000000e+00 : f32
    %72 = vector.broadcast %cst_43 : f32 to vector<9x32xf32>
    %cst_44 = arith.constant 0.000000e+00 : f32
    %73 = vector.shape_cast %35 : vector<1x32xi1> to vector<1x32xi1>
    %74 = vector.broadcast %73 : vector<1x32xi1> to vector<9x32xi1>
    %75 = vector.broadcast %cst_44 : f32 to vector<9x32xf32>
    %76 = arith.select %74, %57, %75 : vector<9x32xi1>, vector<9x32xf32>
    %cst_45 = arith.constant 0.000000e+00 : f32
    %77 = vector.shape_cast %35 : vector<1x32xi1> to vector<1x32xi1>
    %78 = vector.broadcast %77 : vector<1x32xi1> to vector<9x32xi1>
    %79 = vector.broadcast %cst_45 : f32 to vector<9x32xf32>
    %80 = arith.select %78, %71, %79 : vector<9x32xi1>, vector<9x32xf32>
    %cst_46 = arith.constant dense<0.000000e+00> : vector<9x9xf32>
    %81 = tpu.matmul %76, %64, %cst_46 {dimension_numbers = #tpu.dot_dimension_numbers<[1], [1], [0], [0], [0, 0, 1, 0], [], []>} : vector<9x32xf32>, vector<9x32xf32>, vector<9x9xf32> -> vector<9x9xf32>
    %cst_47 = arith.constant 0.353553385 : f32
    %82 = vector.broadcast %cst_47 : f32 to vector<9x9xf32>
    %83 = arith.mulf %81, %82 : vector<9x9xf32>
    %cst_48 = arith.constant dense<0xFF800000> : vector<9xf32>
    %84 = vector.multi_reduction <maximumf>, %83, %cst_48 [1] : vector<9x9xf32> to vector<9xf32>
    %85 = vector.shape_cast %84 : vector<9xf32> to vector<9x1xf32>
    %86 = vector.broadcast %85 : vector<9x1xf32> to vector<9x9xf32>
    %87 = arith.subf %83, %86 : vector<9x9xf32>
    %88 = math.exp %87 : vector<9x9xf32>
    %cst_49 = arith.constant dense<0.000000e+00> : vector<9xf32>
    %89 = vector.multi_reduction <add>, %88, %cst_49 [1] : vector<9x9xf32> to vector<9xf32>
    %90 = vector.shape_cast %89 : vector<9xf32> to vector<9x1xf32>
    %91 = tpu.reciprocal %90 {approx = true} : vector<9x1xf32> -> vector<9x1xf32>
    %92 = vector.broadcast %91 : vector<9x1xf32> to vector<9x9xf32>
    %93 = arith.mulf %88, %92 : vector<9x9xf32>
    %cst_50 = arith.constant dense<0.000000e+00> : vector<9x32xf32>
    %94 = tpu.matmul %93, %80, %cst_50 {dimension_numbers = #tpu.dot_dimension_numbers<[1], [0], [0], [1], [0, 0, 1, 1], [], []>} : vector<9x9xf32>, vector<9x32xf32>, vector<9x32xf32> -> vector<9x32xf32>
    %95 = arith.addf %72, %94 : vector<9x32xf32>
    %cst_51 = arith.constant 0.000000e+00 : f32
    %96 = vector.shape_cast %40 : vector<1x32xi1> to vector<1x32xi1>
    %97 = vector.broadcast %96 : vector<1x32xi1> to vector<9x32xi1>
    %98 = vector.broadcast %cst_51 : f32 to vector<9x32xf32>
    %99 = arith.select %97, %57, %98 : vector<9x32xi1>, vector<9x32xf32>
    %cst_52 = arith.constant 0.000000e+00 : f32
    %100 = vector.shape_cast %40 : vector<1x32xi1> to vector<1x32xi1>
    %101 = vector.broadcast %100 : vector<1x32xi1> to vector<9x32xi1>
    %102 = vector.broadcast %cst_52 : f32 to vector<9x32xf32>
    %103 = arith.select %101, %71, %102 : vector<9x32xi1>, vector<9x32xf32>
    %cst_53 = arith.constant dense<0.000000e+00> : vector<9x9xf32>
    %104 = tpu.matmul %99, %64, %cst_53 {dimension_numbers = #tpu.dot_dimension_numbers<[1], [1], [0], [0], [0, 0, 1, 0], [], []>} : vector<9x32xf32>, vector<9x32xf32>, vector<9x9xf32> -> vector<9x9xf32>
    %cst_54 = arith.constant 0.353553385 : f32
    %105 = vector.broadcast %cst_54 : f32 to vector<9x9xf32>
    %106 = arith.mulf %104, %105 : vector<9x9xf32>
    %cst_55 = arith.constant dense<0xFF800000> : vector<9xf32>
    %107 = vector.multi_reduction <maximumf>, %106, %cst_55 [1] : vector<9x9xf32> to vector<9xf32>
    %108 = vector.shape_cast %107 : vector<9xf32> to vector<9x1xf32>
    %109 = vector.broadcast %108 : vector<9x1xf32> to vector<9x9xf32>
    %110 = arith.subf %106, %109 : vector<9x9xf32>
    %111 = math.exp %110 : vector<9x9xf32>
    %cst_56 = arith.constant dense<0.000000e+00> : vector<9xf32>
    %112 = vector.multi_reduction <add>, %111, %cst_56 [1] : vector<9x9xf32> to vector<9xf32>
    %113 = vector.shape_cast %112 : vector<9xf32> to vector<9x1xf32>
    %114 = tpu.reciprocal %113 {approx = true} : vector<9x1xf32> -> vector<9x1xf32>
    %115 = vector.broadcast %114 : vector<9x1xf32> to vector<9x9xf32>
    %116 = arith.mulf %111, %115 : vector<9x9xf32>
    %cst_57 = arith.constant dense<0.000000e+00> : vector<9x32xf32>
    %117 = tpu.matmul %116, %103, %cst_57 {dimension_numbers = #tpu.dot_dimension_numbers<[1], [0], [0], [1], [0, 0, 1, 1], [], []>} : vector<9x9xf32>, vector<9x32xf32>, vector<9x32xf32> -> vector<9x32xf32>
    %118 = arith.addf %95, %117 : vector<9x32xf32>
    %cst_58 = arith.constant 0.000000e+00 : f32
    %119 = vector.shape_cast %45 : vector<1x32xi1> to vector<1x32xi1>
    %120 = vector.broadcast %119 : vector<1x32xi1> to vector<9x32xi1>
    %121 = vector.broadcast %cst_58 : f32 to vector<9x32xf32>
    %122 = arith.select %120, %57, %121 : vector<9x32xi1>, vector<9x32xf32>
    %cst_59 = arith.constant 0.000000e+00 : f32
    %123 = vector.shape_cast %45 : vector<1x32xi1> to vector<1x32xi1>
    %124 = vector.broadcast %123 : vector<1x32xi1> to vector<9x32xi1>
    %125 = vector.broadcast %cst_59 : f32 to vector<9x32xf32>
    %126 = arith.select %124, %71, %125 : vector<9x32xi1>, vector<9x32xf32>
    %cst_60 = arith.constant dense<0.000000e+00> : vector<9x9xf32>
    %127 = tpu.matmul %122, %64, %cst_60 {dimension_numbers = #tpu.dot_dimension_numbers<[1], [1], [0], [0], [0, 0, 1, 0], [], []>} : vector<9x32xf32>, vector<9x32xf32>, vector<9x9xf32> -> vector<9x9xf32>
    %cst_61 = arith.constant 0.353553385 : f32
    %128 = vector.broadcast %cst_61 : f32 to vector<9x9xf32>
    %129 = arith.mulf %127, %128 : vector<9x9xf32>
    %cst_62 = arith.constant dense<0xFF800000> : vector<9xf32>
    %130 = vector.multi_reduction <maximumf>, %129, %cst_62 [1] : vector<9x9xf32> to vector<9xf32>
    %131 = vector.shape_cast %130 : vector<9xf32> to vector<9x1xf32>
    %132 = vector.broadcast %131 : vector<9x1xf32> to vector<9x9xf32>
    %133 = arith.subf %129, %132 : vector<9x9xf32>
    %134 = math.exp %133 : vector<9x9xf32>
    %cst_63 = arith.constant dense<0.000000e+00> : vector<9xf32>
    %135 = vector.multi_reduction <add>, %134, %cst_63 [1] : vector<9x9xf32> to vector<9xf32>
    %136 = vector.shape_cast %135 : vector<9xf32> to vector<9x1xf32>
    %137 = tpu.reciprocal %136 {approx = true} : vector<9x1xf32> -> vector<9x1xf32>
    %138 = vector.broadcast %137 : vector<9x1xf32> to vector<9x9xf32>
    %139 = arith.mulf %134, %138 : vector<9x9xf32>
    %cst_64 = arith.constant dense<0.000000e+00> : vector<9x32xf32>
    %140 = tpu.matmul %139, %126, %cst_64 {dimension_numbers = #tpu.dot_dimension_numbers<[1], [0], [0], [1], [0, 0, 1, 1], [], []>} : vector<9x9xf32>, vector<9x32xf32>, vector<9x32xf32> -> vector<9x32xf32>
    %141 = arith.addf %118, %140 : vector<9x32xf32>
    %cst_65 = arith.constant 0.000000e+00 : f32
    %142 = vector.shape_cast %50 : vector<1x32xi1> to vector<1x32xi1>
    %143 = vector.broadcast %142 : vector<1x32xi1> to vector<9x32xi1>
    %144 = vector.broadcast %cst_65 : f32 to vector<9x32xf32>
    %145 = arith.select %143, %57, %144 : vector<9x32xi1>, vector<9x32xf32>
    %cst_66 = arith.constant 0.000000e+00 : f32
    %146 = vector.shape_cast %50 : vector<1x32xi1> to vector<1x32xi1>
    %147 = vector.broadcast %146 : vector<1x32xi1> to vector<9x32xi1>
    %148 = vector.broadcast %cst_66 : f32 to vector<9x32xf32>
    %149 = arith.select %147, %71, %148 : vector<9x32xi1>, vector<9x32xf32>
    %cst_67 = arith.constant dense<0.000000e+00> : vector<9x9xf32>
    %150 = tpu.matmul %145, %64, %cst_67 {dimension_numbers = #tpu.dot_dimension_numbers<[1], [1], [0], [0], [0, 0, 1, 0], [], []>} : vector<9x32xf32>, vector<9x32xf32>, vector<9x9xf32> -> vector<9x9xf32>
    %cst_68 = arith.constant 0.353553385 : f32
    %151 = vector.broadcast %cst_68 : f32 to vector<9x9xf32>
    %152 = arith.mulf %150, %151 : vector<9x9xf32>
    %cst_69 = arith.constant dense<0xFF800000> : vector<9xf32>
    %153 = vector.multi_reduction <maximumf>, %152, %cst_69 [1] : vector<9x9xf32> to vector<9xf32>
    %154 = vector.shape_cast %153 : vector<9xf32> to vector<9x1xf32>
    %155 = vector.broadcast %154 : vector<9x1xf32> to vector<9x9xf32>
    %156 = arith.subf %152, %155 : vector<9x9xf32>
    %157 = math.exp %156 : vector<9x9xf32>
    %cst_70 = arith.constant dense<0.000000e+00> : vector<9xf32>
    %158 = vector.multi_reduction <add>, %157, %cst_70 [1] : vector<9x9xf32> to vector<9xf32>
    %159 = vector.shape_cast %158 : vector<9xf32> to vector<9x1xf32>
    %160 = tpu.reciprocal %159 {approx = true} : vector<9x1xf32> -> vector<9x1xf32>
    %161 = vector.broadcast %160 : vector<9x1xf32> to vector<9x9xf32>
    %162 = arith.mulf %157, %161 : vector<9x9xf32>
    %cst_71 = arith.constant dense<0.000000e+00> : vector<9x32xf32>
    %163 = tpu.matmul %162, %149, %cst_71 {dimension_numbers = #tpu.dot_dimension_numbers<[1], [0], [0], [1], [0, 0, 1, 1], [], []>} : vector<9x9xf32>, vector<9x32xf32>, vector<9x32xf32> -> vector<9x32xf32>
    %164 = arith.addf %141, %163 : vector<9x32xf32>
    %c0_72 = arith.constant 0 : index
    %c0_73 = arith.constant 0 : index
    %c0_74 = arith.constant 0 : index
    %165 = vector.load %arg8[%c0_72, %c0_73, %c0_74] : memref<2x32x32xf32, #tpu.memory_space<vmem>>, vector<1x32x32xf32>
    %166 = vector.shape_cast %165 : vector<1x32x32xf32> to vector<32x32xf32>
    %cst_75 = arith.constant dense<0.000000e+00> : vector<9x32xf32>
    %167 = tpu.matmul %164, %166, %cst_75 {dimension_numbers = #tpu.dot_dimension_numbers<[1], [0], [0], [1], [0, 0, 1, 1], [], []>} : vector<9x32xf32>, vector<32x32xf32>, vector<9x32xf32> -> vector<9x32xf32>
    %c0_76 = arith.constant 0 : index
    %c0_77 = arith.constant 0 : index
    %c0_78 = arith.constant 0 : index
    %168 = vector.load %arg9[%c0_76, %c0_77, %c0_78] : memref<2x1x32xf32, #tpu.memory_space<vmem>>, vector<1x1x32xf32>
    %169 = vector.shape_cast %168 : vector<1x1x32xf32> to vector<1x32xf32>
    %170 = vector.broadcast %169 : vector<1x32xf32> to vector<9x32xf32>
    %171 = arith.addf %167, %170 : vector<9x32xf32>
    %172 = arith.addf %29, %171 : vector<9x32xf32>
    %c0_79 = arith.constant 0 : index
    %c0_80 = arith.constant 0 : index
    %c0_81 = arith.constant 0 : index
    %173 = vector.load %arg10[%c0_79, %c0_80, %c0_81] : memref<2x1x32xf32, #tpu.memory_space<vmem>>, vector<1x1x32xf32>
    %174 = vector.shape_cast %173 : vector<1x1x32xf32> to vector<1x32xf32>
    %c0_82 = arith.constant 0 : index
    %c0_83 = arith.constant 0 : index
    %c0_84 = arith.constant 0 : index
    %175 = vector.load %arg11[%c0_82, %c0_83, %c0_84] : memref<2x1x32xf32, #tpu.memory_space<vmem>>, vector<1x1x32xf32>
    %176 = vector.shape_cast %175 : vector<1x1x32xf32> to vector<1x32xf32>
    %cst_85 = arith.constant dense<0.000000e+00> : vector<9xf32>
    %177 = vector.multi_reduction <add>, %172, %cst_85 [1] : vector<9x32xf32> to vector<9xf32>
    %178 = vector.shape_cast %177 : vector<9xf32> to vector<9x1xf32>
    %cst_86 = arith.constant 3.200000e+01 : f32
    %179 = vector.broadcast %cst_86 : f32 to vector<9x1xf32>
    %180 = arith.divf %178, %179 : vector<9x1xf32>
    %181 = vector.broadcast %180 : vector<9x1xf32> to vector<9x32xf32>
    %182 = arith.subf %172, %181 : vector<9x32xf32>
    %183 = arith.mulf %182, %182 : vector<9x32xf32>
    %cst_87 = arith.constant dense<0.000000e+00> : vector<9xf32>
    %184 = vector.multi_reduction <add>, %183, %cst_87 [1] : vector<9x32xf32> to vector<9xf32>
    %185 = vector.shape_cast %184 : vector<9xf32> to vector<9x1xf32>
    %cst_88 = arith.constant 3.200000e+01 : f32
    %186 = vector.broadcast %cst_88 : f32 to vector<9x1xf32>
    %187 = arith.divf %185, %186 : vector<9x1xf32>
    %188 = vector.broadcast %180 : vector<9x1xf32> to vector<9x32xf32>
    %189 = arith.subf %172, %188 : vector<9x32xf32>
    %cst_89 = arith.constant 9.99999996E-13 : f32
    %190 = vector.broadcast %cst_89 : f32 to vector<9x1xf32>
    %191 = arith.addf %187, %190 : vector<9x1xf32>
    %192 = math.rsqrt %191 : vector<9x1xf32>
    %193 = vector.broadcast %192 : vector<9x1xf32> to vector<9x32xf32>
    %194 = arith.mulf %189, %193 : vector<9x32xf32>
    %195 = vector.broadcast %174 : vector<1x32xf32> to vector<9x32xf32>
    %196 = arith.mulf %194, %195 : vector<9x32xf32>
    %197 = vector.broadcast %176 : vector<1x32xf32> to vector<9x32xf32>
    %198 = arith.addf %196, %197 : vector<9x32xf32>
    %c0_90 = arith.constant 0 : index
    %c0_91 = arith.constant 0 : index
    %c0_92 = arith.constant 0 : index
    %199 = vector.load %arg12[%c0_90, %c0_91, %c0_92] : memref<2x32x64xf32, #tpu.memory_space<vmem>>, vector<1x32x64xf32>
    %200 = vector.shape_cast %199 : vector<1x32x64xf32> to vector<32x64xf32>
    %cst_93 = arith.constant dense<0.000000e+00> : vector<9x64xf32>
    %201 = tpu.matmul %198, %200, %cst_93 {dimension_numbers = #tpu.dot_dimension_numbers<[1], [0], [0], [1], [0, 0, 1, 1], [], []>} : vector<9x32xf32>, vector<32x64xf32>, vector<9x64xf32> -> vector<9x64xf32>
    %c0_94 = arith.constant 0 : index
    %c0_95 = arith.constant 0 : index
    %c0_96 = arith.constant 0 : index
    %202 = vector.load %arg13[%c0_94, %c0_95, %c0_96] : memref<2x1x64xf32, #tpu.memory_space<vmem>>, vector<1x1x64xf32>
    %203 = vector.shape_cast %202 : vector<1x1x64xf32> to vector<1x64xf32>
    %204 = vector.broadcast %203 : vector<1x64xf32> to vector<9x64xf32>
    %205 = arith.addf %201, %204 : vector<9x64xf32>
    %cst_97 = arith.constant 5.000000e-01 : f32
    %206 = vector.broadcast %cst_97 : f32 to vector<9x64xf32>
    %207 = arith.mulf %206, %205 : vector<9x64xf32>
    %cst_98 = arith.constant 4.471500e-02 : f32
    %208 = vector.broadcast %cst_98 : f32 to vector<9x64xf32>
    %209 = arith.mulf %208, %205 : vector<9x64xf32>
    %210 = arith.mulf %209, %205 : vector<9x64xf32>
    %211 = arith.mulf %210, %205 : vector<9x64xf32>
    %212 = arith.addf %205, %211 : vector<9x64xf32>
    %cst_99 = arith.constant 0.797884583 : f32
    %213 = vector.broadcast %cst_99 : f32 to vector<9x64xf32>
    %214 = arith.mulf %213, %212 : vector<9x64xf32>
    %215 = math.tanh %214 : vector<9x64xf32>
    %cst_100 = arith.constant 1.000000e+00 : f32
    %216 = vector.broadcast %cst_100 : f32 to vector<9x64xf32>
    %217 = arith.addf %216, %215 : vector<9x64xf32>
    %218 = arith.mulf %207, %217 : vector<9x64xf32>
    %c0_101 = arith.constant 0 : index
    %c0_102 = arith.constant 0 : index
    %c0_103 = arith.constant 0 : index
    %219 = vector.load %arg14[%c0_101, %c0_102, %c0_103] : memref<2x64x32xf32, #tpu.memory_space<vmem>>, vector<1x64x32xf32>
    %220 = vector.shape_cast %219 : vector<1x64x32xf32> to vector<64x32xf32>
    %cst_104 = arith.constant dense<0.000000e+00> : vector<9x32xf32>
    %221 = tpu.matmul %218, %220, %cst_104 {dimension_numbers = #tpu.dot_dimension_numbers<[1], [0], [0], [1], [0, 0, 1, 1], [], []>} : vector<9x64xf32>, vector<64x32xf32>, vector<9x32xf32> -> vector<9x32xf32>
    %c0_105 = arith.constant 0 : index
    %c0_106 = arith.constant 0 : index
    %c0_107 = arith.constant 0 : index
    %222 = vector.load %arg15[%c0_105, %c0_106, %c0_107] : memref<2x1x32xf32, #tpu.memory_space<vmem>>, vector<1x1x32xf32>
    %223 = vector.shape_cast %222 : vector<1x1x32xf32> to vector<1x32xf32>
    %224 = vector.broadcast %223 : vector<1x32xf32> to vector<9x32xf32>
    %225 = arith.addf %221, %224 : vector<9x32xf32>
    %226 = arith.addf %198, %225 : vector<9x32xf32>
    %c0_108 = arith.constant 0 : index
    %c0_109 = arith.constant 0 : index
    %c0_110 = arith.constant 0 : index
    %227 = vector.load %arg16[%c0_108, %c0_109, %c0_110] : memref<2x1x32xf32, #tpu.memory_space<vmem>>, vector<1x1x32xf32>
    %228 = vector.shape_cast %227 : vector<1x1x32xf32> to vector<1x32xf32>
    %c0_111 = arith.constant 0 : index
    %c0_112 = arith.constant 0 : index
    %c0_113 = arith.constant 0 : index
    %229 = vector.load %arg17[%c0_111, %c0_112, %c0_113] : memref<2x1x32xf32, #tpu.memory_space<vmem>>, vector<1x1x32xf32>
    %230 = vector.shape_cast %229 : vector<1x1x32xf32> to vector<1x32xf32>
    %cst_114 = arith.constant dense<0.000000e+00> : vector<9xf32>
    %231 = vector.multi_reduction <add>, %226, %cst_114 [1] : vector<9x32xf32> to vector<9xf32>
    %232 = vector.shape_cast %231 : vector<9xf32> to vector<9x1xf32>
    %cst_115 = arith.constant 3.200000e+01 : f32
    %233 = vector.broadcast %cst_115 : f32 to vector<9x1xf32>
    %234 = arith.divf %232, %233 : vector<9x1xf32>
    %235 = vector.broadcast %234 : vector<9x1xf32> to vector<9x32xf32>
    %236 = arith.subf %226, %235 : vector<9x32xf32>
    %237 = arith.mulf %236, %236 : vector<9x32xf32>
    %cst_116 = arith.constant dense<0.000000e+00> : vector<9xf32>
    %238 = vector.multi_reduction <add>, %237, %cst_116 [1] : vector<9x32xf32> to vector<9xf32>
    %239 = vector.shape_cast %238 : vector<9xf32> to vector<9x1xf32>
    %cst_117 = arith.constant 3.200000e+01 : f32
    %240 = vector.broadcast %cst_117 : f32 to vector<9x1xf32>
    %241 = arith.divf %239, %240 : vector<9x1xf32>
    %242 = vector.broadcast %234 : vector<9x1xf32> to vector<9x32xf32>
    %243 = arith.subf %226, %242 : vector<9x32xf32>
    %cst_118 = arith.constant 9.99999996E-13 : f32
    %244 = vector.broadcast %cst_118 : f32 to vector<9x1xf32>
    %245 = arith.addf %241, %244 : vector<9x1xf32>
    %246 = math.rsqrt %245 : vector<9x1xf32>
    %247 = vector.broadcast %246 : vector<9x1xf32> to vector<9x32xf32>
    %248 = arith.mulf %243, %247 : vector<9x32xf32>
    %249 = vector.broadcast %228 : vector<1x32xf32> to vector<9x32xf32>
    %250 = arith.mulf %248, %249 : vector<9x32xf32>
    %251 = vector.broadcast %230 : vector<1x32xf32> to vector<9x32xf32>
    %252 = arith.addf %250, %251 : vector<9x32xf32>
    %c1_119 = arith.constant 1 : index
    %c0_120 = arith.constant 0 : index
    %c0_121 = arith.constant 0 : index
    %c0_122 = arith.constant 0 : index
    %253 = vector.load %arg6[%c1_119, %c0_120, %c0_121, %c0_122] : memref<2x3x32x32xf32, #tpu.memory_space<vmem>>, vector<1x1x32x32xf32>
    %254 = vector.shape_cast %253 : vector<1x1x32x32xf32> to vector<32x32xf32>
    %cst_123 = arith.constant dense<0.000000e+00> : vector<9x32xf32>
    %255 = tpu.matmul %252, %254, %cst_123 {dimension_numbers = #tpu.dot_dimension_numbers<[1], [0], [0], [1], [0, 0, 1, 1], [], []>} : vector<9x32xf32>, vector<32x32xf32>, vector<9x32xf32> -> vector<9x32xf32>
    %c1_124 = arith.constant 1 : index
    %c0_125 = arith.constant 0 : index
    %c0_126 = arith.constant 0 : index
    %c0_127 = arith.constant 0 : index
    %256 = vector.load %arg7[%c1_124, %c0_125, %c0_126, %c0_127] : memref<2x3x1x32xf32, #tpu.memory_space<vmem>>, vector<1x1x1x32xf32>
    %257 = vector.shape_cast %256 : vector<1x1x1x32xf32> to vector<1x32xf32>
    %258 = vector.broadcast %257 : vector<1x32xf32> to vector<9x32xf32>
    %259 = arith.addf %255, %258 : vector<9x32xf32>
    %c1_128 = arith.constant 1 : index
    %c1_129 = arith.constant 1 : index
    %c0_130 = arith.constant 0 : index
    %c0_131 = arith.constant 0 : index
    %260 = vector.load %arg6[%c1_128, %c1_129, %c0_130, %c0_131] : memref<2x3x32x32xf32, #tpu.memory_space<vmem>>, vector<1x1x32x32xf32>
    %261 = vector.shape_cast %260 : vector<1x1x32x32xf32> to vector<32x32xf32>
    %cst_132 = arith.constant dense<0.000000e+00> : vector<9x32xf32>
    %262 = tpu.matmul %252, %261, %cst_132 {dimension_numbers = #tpu.dot_dimension_numbers<[1], [0], [0], [1], [0, 0, 1, 1], [], []>} : vector<9x32xf32>, vector<32x32xf32>, vector<9x32xf32> -> vector<9x32xf32>
    %c1_133 = arith.constant 1 : index
    %c1_134 = arith.constant 1 : index
    %c0_135 = arith.constant 0 : index
    %c0_136 = arith.constant 0 : index
    %263 = vector.load %arg7[%c1_133, %c1_134, %c0_135, %c0_136] : memref<2x3x1x32xf32, #tpu.memory_space<vmem>>, vector<1x1x1x32xf32>
    %264 = vector.shape_cast %263 : vector<1x1x1x32xf32> to vector<1x32xf32>
    %265 = vector.broadcast %264 : vector<1x32xf32> to vector<9x32xf32>
    %266 = arith.addf %262, %265 : vector<9x32xf32>
    %c1_137 = arith.constant 1 : index
    %c2_138 = arith.constant 2 : index
    %c0_139 = arith.constant 0 : index
    %c0_140 = arith.constant 0 : index
    %267 = vector.load %arg6[%c1_137, %c2_138, %c0_139, %c0_140] : memref<2x3x32x32xf32, #tpu.memory_space<vmem>>, vector<1x1x32x32xf32>
    %268 = vector.shape_cast %267 : vector<1x1x32x32xf32> to vector<32x32xf32>
    %cst_141 = arith.constant dense<0.000000e+00> : vector<9x32xf32>
    %269 = tpu.matmul %252, %268, %cst_141 {dimension_numbers = #tpu.dot_dimension_numbers<[1], [0], [0], [1], [0, 0, 1, 1], [], []>} : vector<9x32xf32>, vector<32x32xf32>, vector<9x32xf32> -> vector<9x32xf32>
    %c1_142 = arith.constant 1 : index
    %c2_143 = arith.constant 2 : index
    %c0_144 = arith.constant 0 : index
    %c0_145 = arith.constant 0 : index
    %270 = vector.load %arg7[%c1_142, %c2_143, %c0_144, %c0_145] : memref<2x3x1x32xf32, #tpu.memory_space<vmem>>, vector<1x1x1x32xf32>
    %271 = vector.shape_cast %270 : vector<1x1x1x32xf32> to vector<1x32xf32>
    %272 = vector.broadcast %271 : vector<1x32xf32> to vector<9x32xf32>
    %273 = arith.addf %269, %272 : vector<9x32xf32>
    %cst_146 = arith.constant 0.000000e+00 : f32
    %274 = vector.broadcast %cst_146 : f32 to vector<9x32xf32>
    %cst_147 = arith.constant 0.000000e+00 : f32
    %275 = vector.shape_cast %35 : vector<1x32xi1> to vector<1x32xi1>
    %276 = vector.broadcast %275 : vector<1x32xi1> to vector<9x32xi1>
    %277 = vector.broadcast %cst_147 : f32 to vector<9x32xf32>
    %278 = arith.select %276, %259, %277 : vector<9x32xi1>, vector<9x32xf32>
    %cst_148 = arith.constant 0.000000e+00 : f32
    %279 = vector.shape_cast %35 : vector<1x32xi1> to vector<1x32xi1>
    %280 = vector.broadcast %279 : vector<1x32xi1> to vector<9x32xi1>
    %281 = vector.broadcast %cst_148 : f32 to vector<9x32xf32>
    %282 = arith.select %280, %273, %281 : vector<9x32xi1>, vector<9x32xf32>
    %cst_149 = arith.constant dense<0.000000e+00> : vector<9x9xf32>
    %283 = tpu.matmul %278, %266, %cst_149 {dimension_numbers = #tpu.dot_dimension_numbers<[1], [1], [0], [0], [0, 0, 1, 0], [], []>} : vector<9x32xf32>, vector<9x32xf32>, vector<9x9xf32> -> vector<9x9xf32>
    %cst_150 = arith.constant 0.353553385 : f32
    %284 = vector.broadcast %cst_150 : f32 to vector<9x9xf32>
    %285 = arith.mulf %283, %284 : vector<9x9xf32>
    %cst_151 = arith.constant dense<0xFF800000> : vector<9xf32>
    %286 = vector.multi_reduction <maximumf>, %285, %cst_151 [1] : vector<9x9xf32> to vector<9xf32>
    %287 = vector.shape_cast %286 : vector<9xf32> to vector<9x1xf32>
    %288 = vector.broadcast %287 : vector<9x1xf32> to vector<9x9xf32>
    %289 = arith.subf %285, %288 : vector<9x9xf32>
    %290 = math.exp %289 : vector<9x9xf32>
    %cst_152 = arith.constant dense<0.000000e+00> : vector<9xf32>
    %291 = vector.multi_reduction <add>, %290, %cst_152 [1] : vector<9x9xf32> to vector<9xf32>
    %292 = vector.shape_cast %291 : vector<9xf32> to vector<9x1xf32>
    %293 = tpu.reciprocal %292 {approx = true} : vector<9x1xf32> -> vector<9x1xf32>
    %294 = vector.broadcast %293 : vector<9x1xf32> to vector<9x9xf32>
    %295 = arith.mulf %290, %294 : vector<9x9xf32>
    %cst_153 = arith.constant dense<0.000000e+00> : vector<9x32xf32>
    %296 = tpu.matmul %295, %282, %cst_153 {dimension_numbers = #tpu.dot_dimension_numbers<[1], [0], [0], [1], [0, 0, 1, 1], [], []>} : vector<9x9xf32>, vector<9x32xf32>, vector<9x32xf32> -> vector<9x32xf32>
    %297 = arith.addf %274, %296 : vector<9x32xf32>
    %cst_154 = arith.constant 0.000000e+00 : f32
    %298 = vector.shape_cast %40 : vector<1x32xi1> to vector<1x32xi1>
    %299 = vector.broadcast %298 : vector<1x32xi1> to vector<9x32xi1>
    %300 = vector.broadcast %cst_154 : f32 to vector<9x32xf32>
    %301 = arith.select %299, %259, %300 : vector<9x32xi1>, vector<9x32xf32>
    %cst_155 = arith.constant 0.000000e+00 : f32
    %302 = vector.shape_cast %40 : vector<1x32xi1> to vector<1x32xi1>
    %303 = vector.broadcast %302 : vector<1x32xi1> to vector<9x32xi1>
    %304 = vector.broadcast %cst_155 : f32 to vector<9x32xf32>
    %305 = arith.select %303, %273, %304 : vector<9x32xi1>, vector<9x32xf32>
    %cst_156 = arith.constant dense<0.000000e+00> : vector<9x9xf32>
    %306 = tpu.matmul %301, %266, %cst_156 {dimension_numbers = #tpu.dot_dimension_numbers<[1], [1], [0], [0], [0, 0, 1, 0], [], []>} : vector<9x32xf32>, vector<9x32xf32>, vector<9x9xf32> -> vector<9x9xf32>
    %cst_157 = arith.constant 0.353553385 : f32
    %307 = vector.broadcast %cst_157 : f32 to vector<9x9xf32>
    %308 = arith.mulf %306, %307 : vector<9x9xf32>
    %cst_158 = arith.constant dense<0xFF800000> : vector<9xf32>
    %309 = vector.multi_reduction <maximumf>, %308, %cst_158 [1] : vector<9x9xf32> to vector<9xf32>
    %310 = vector.shape_cast %309 : vector<9xf32> to vector<9x1xf32>
    %311 = vector.broadcast %310 : vector<9x1xf32> to vector<9x9xf32>
    %312 = arith.subf %308, %311 : vector<9x9xf32>
    %313 = math.exp %312 : vector<9x9xf32>
    %cst_159 = arith.constant dense<0.000000e+00> : vector<9xf32>
    %314 = vector.multi_reduction <add>, %313, %cst_159 [1] : vector<9x9xf32> to vector<9xf32>
    %315 = vector.shape_cast %314 : vector<9xf32> to vector<9x1xf32>
    %316 = tpu.reciprocal %315 {approx = true} : vector<9x1xf32> -> vector<9x1xf32>
    %317 = vector.broadcast %316 : vector<9x1xf32> to vector<9x9xf32>
    %318 = arith.mulf %313, %317 : vector<9x9xf32>
    %cst_160 = arith.constant dense<0.000000e+00> : vector<9x32xf32>
    %319 = tpu.matmul %318, %305, %cst_160 {dimension_numbers = #tpu.dot_dimension_numbers<[1], [0], [0], [1], [0, 0, 1, 1], [], []>} : vector<9x9xf32>, vector<9x32xf32>, vector<9x32xf32> -> vector<9x32xf32>
    %320 = arith.addf %297, %319 : vector<9x32xf32>
    %cst_161 = arith.constant 0.000000e+00 : f32
    %321 = vector.shape_cast %45 : vector<1x32xi1> to vector<1x32xi1>
    %322 = vector.broadcast %321 : vector<1x32xi1> to vector<9x32xi1>
    %323 = vector.broadcast %cst_161 : f32 to vector<9x32xf32>
    %324 = arith.select %322, %259, %323 : vector<9x32xi1>, vector<9x32xf32>
    %cst_162 = arith.constant 0.000000e+00 : f32
    %325 = vector.shape_cast %45 : vector<1x32xi1> to vector<1x32xi1>
    %326 = vector.broadcast %325 : vector<1x32xi1> to vector<9x32xi1>
    %327 = vector.broadcast %cst_162 : f32 to vector<9x32xf32>
    %328 = arith.select %326, %273, %327 : vector<9x32xi1>, vector<9x32xf32>
    %cst_163 = arith.constant dense<0.000000e+00> : vector<9x9xf32>
    %329 = tpu.matmul %324, %266, %cst_163 {dimension_numbers = #tpu.dot_dimension_numbers<[1], [1], [0], [0], [0, 0, 1, 0], [], []>} : vector<9x32xf32>, vector<9x32xf32>, vector<9x9xf32> -> vector<9x9xf32>
    %cst_164 = arith.constant 0.353553385 : f32
    %330 = vector.broadcast %cst_164 : f32 to vector<9x9xf32>
    %331 = arith.mulf %329, %330 : vector<9x9xf32>
    %cst_165 = arith.constant dense<0xFF800000> : vector<9xf32>
    %332 = vector.multi_reduction <maximumf>, %331, %cst_165 [1] : vector<9x9xf32> to vector<9xf32>
    %333 = vector.shape_cast %332 : vector<9xf32> to vector<9x1xf32>
    %334 = vector.broadcast %333 : vector<9x1xf32> to vector<9x9xf32>
    %335 = arith.subf %331, %334 : vector<9x9xf32>
    %336 = math.exp %335 : vector<9x9xf32>
    %cst_166 = arith.constant dense<0.000000e+00> : vector<9xf32>
    %337 = vector.multi_reduction <add>, %336, %cst_166 [1] : vector<9x9xf32> to vector<9xf32>
    %338 = vector.shape_cast %337 : vector<9xf32> to vector<9x1xf32>
    %339 = tpu.reciprocal %338 {approx = true} : vector<9x1xf32> -> vector<9x1xf32>
    %340 = vector.broadcast %339 : vector<9x1xf32> to vector<9x9xf32>
    %341 = arith.mulf %336, %340 : vector<9x9xf32>
    %cst_167 = arith.constant dense<0.000000e+00> : vector<9x32xf32>
    %342 = tpu.matmul %341, %328, %cst_167 {dimension_numbers = #tpu.dot_dimension_numbers<[1], [0], [0], [1], [0, 0, 1, 1], [], []>} : vector<9x9xf32>, vector<9x32xf32>, vector<9x32xf32> -> vector<9x32xf32>
    %343 = arith.addf %320, %342 : vector<9x32xf32>
    %cst_168 = arith.constant 0.000000e+00 : f32
    %344 = vector.shape_cast %50 : vector<1x32xi1> to vector<1x32xi1>
    %345 = vector.broadcast %344 : vector<1x32xi1> to vector<9x32xi1>
    %346 = vector.broadcast %cst_168 : f32 to vector<9x32xf32>
    %347 = arith.select %345, %259, %346 : vector<9x32xi1>, vector<9x32xf32>
    %cst_169 = arith.constant 0.000000e+00 : f32
    %348 = vector.shape_cast %50 : vector<1x32xi1> to vector<1x32xi1>
    %349 = vector.broadcast %348 : vector<1x32xi1> to vector<9x32xi1>
    %350 = vector.broadcast %cst_169 : f32 to vector<9x32xf32>
    %351 = arith.select %349, %273, %350 : vector<9x32xi1>, vector<9x32xf32>
    %cst_170 = arith.constant dense<0.000000e+00> : vector<9x9xf32>
    %352 = tpu.matmul %347, %266, %cst_170 {dimension_numbers = #tpu.dot_dimension_numbers<[1], [1], [0], [0], [0, 0, 1, 0], [], []>} : vector<9x32xf32>, vector<9x32xf32>, vector<9x9xf32> -> vector<9x9xf32>
    %cst_171 = arith.constant 0.353553385 : f32
    %353 = vector.broadcast %cst_171 : f32 to vector<9x9xf32>
    %354 = arith.mulf %352, %353 : vector<9x9xf32>
    %cst_172 = arith.constant dense<0xFF800000> : vector<9xf32>
    %355 = vector.multi_reduction <maximumf>, %354, %cst_172 [1] : vector<9x9xf32> to vector<9xf32>
    %356 = vector.shape_cast %355 : vector<9xf32> to vector<9x1xf32>
    %357 = vector.broadcast %356 : vector<9x1xf32> to vector<9x9xf32>
    %358 = arith.subf %354, %357 : vector<9x9xf32>
    %359 = math.exp %358 : vector<9x9xf32>
    %cst_173 = arith.constant dense<0.000000e+00> : vector<9xf32>
    %360 = vector.multi_reduction <add>, %359, %cst_173 [1] : vector<9x9xf32> to vector<9xf32>
    %361 = vector.shape_cast %360 : vector<9xf32> to vector<9x1xf32>
    %362 = tpu.reciprocal %361 {approx = true} : vector<9x1xf32> -> vector<9x1xf32>
    %363 = vector.broadcast %362 : vector<9x1xf32> to vector<9x9xf32>
    %364 = arith.mulf %359, %363 : vector<9x9xf32>
    %cst_174 = arith.constant dense<0.000000e+00> : vector<9x32xf32>
    %365 = tpu.matmul %364, %351, %cst_174 {dimension_numbers = #tpu.dot_dimension_numbers<[1], [0], [0], [1], [0, 0, 1, 1], [], []>} : vector<9x9xf32>, vector<9x32xf32>, vector<9x32xf32> -> vector<9x32xf32>
    %366 = arith.addf %343, %365 : vector<9x32xf32>
    %c1_175 = arith.constant 1 : index
    %c0_176 = arith.constant 0 : index
    %c0_177 = arith.constant 0 : index
    %367 = vector.load %arg8[%c1_175, %c0_176, %c0_177] : memref<2x32x32xf32, #tpu.memory_space<vmem>>, vector<1x32x32xf32>
    %368 = vector.shape_cast %367 : vector<1x32x32xf32> to vector<32x32xf32>
    %cst_178 = arith.constant dense<0.000000e+00> : vector<9x32xf32>
    %369 = tpu.matmul %366, %368, %cst_178 {dimension_numbers = #tpu.dot_dimension_numbers<[1], [0], [0], [1], [0, 0, 1, 1], [], []>} : vector<9x32xf32>, vector<32x32xf32>, vector<9x32xf32> -> vector<9x32xf32>
    %c1_179 = arith.constant 1 : index
    %c0_180 = arith.constant 0 : index
    %c0_181 = arith.constant 0 : index
    %370 = vector.load %arg9[%c1_179, %c0_180, %c0_181] : memref<2x1x32xf32, #tpu.memory_space<vmem>>, vector<1x1x32xf32>
    %371 = vector.shape_cast %370 : vector<1x1x32xf32> to vector<1x32xf32>
    %372 = vector.broadcast %371 : vector<1x32xf32> to vector<9x32xf32>
    %373 = arith.addf %369, %372 : vector<9x32xf32>
    %374 = arith.addf %252, %373 : vector<9x32xf32>
    %c1_182 = arith.constant 1 : index
    %c0_183 = arith.constant 0 : index
    %c0_184 = arith.constant 0 : index
    %375 = vector.load %arg10[%c1_182, %c0_183, %c0_184] : memref<2x1x32xf32, #tpu.memory_space<vmem>>, vector<1x1x32xf32>
    %376 = vector.shape_cast %375 : vector<1x1x32xf32> to vector<1x32xf32>
    %c1_185 = arith.constant 1 : index
    %c0_186 = arith.constant 0 : index
    %c0_187 = arith.constant 0 : index
    %377 = vector.load %arg11[%c1_185, %c0_186, %c0_187] : memref<2x1x32xf32, #tpu.memory_space<vmem>>, vector<1x1x32xf32>
    %378 = vector.shape_cast %377 : vector<1x1x32xf32> to vector<1x32xf32>
    %cst_188 = arith.constant dense<0.000000e+00> : vector<9xf32>
    %379 = vector.multi_reduction <add>, %374, %cst_188 [1] : vector<9x32xf32> to vector<9xf32>
    %380 = vector.shape_cast %379 : vector<9xf32> to vector<9x1xf32>
    %cst_189 = arith.constant 3.200000e+01 : f32
    %381 = vector.broadcast %cst_189 : f32 to vector<9x1xf32>
    %382 = arith.divf %380, %381 : vector<9x1xf32>
    %383 = vector.broadcast %382 : vector<9x1xf32> to vector<9x32xf32>
    %384 = arith.subf %374, %383 : vector<9x32xf32>
    %385 = arith.mulf %384, %384 : vector<9x32xf32>
    %cst_190 = arith.constant dense<0.000000e+00> : vector<9xf32>
    %386 = vector.multi_reduction <add>, %385, %cst_190 [1] : vector<9x32xf32> to vector<9xf32>
    %387 = vector.shape_cast %386 : vector<9xf32> to vector<9x1xf32>
    %cst_191 = arith.constant 3.200000e+01 : f32
    %388 = vector.broadcast %cst_191 : f32 to vector<9x1xf32>
    %389 = arith.divf %387, %388 : vector<9x1xf32>
    %390 = vector.broadcast %382 : vector<9x1xf32> to vector<9x32xf32>
    %391 = arith.subf %374, %390 : vector<9x32xf32>
    %cst_192 = arith.constant 9.99999996E-13 : f32
    %392 = vector.broadcast %cst_192 : f32 to vector<9x1xf32>
    %393 = arith.addf %389, %392 : vector<9x1xf32>
    %394 = math.rsqrt %393 : vector<9x1xf32>
    %395 = vector.broadcast %394 : vector<9x1xf32> to vector<9x32xf32>
    %396 = arith.mulf %391, %395 : vector<9x32xf32>
    %397 = vector.broadcast %376 : vector<1x32xf32> to vector<9x32xf32>
    %398 = arith.mulf %396, %397 : vector<9x32xf32>
    %399 = vector.broadcast %378 : vector<1x32xf32> to vector<9x32xf32>
    %400 = arith.addf %398, %399 : vector<9x32xf32>
    %c1_193 = arith.constant 1 : index
    %c0_194 = arith.constant 0 : index
    %c0_195 = arith.constant 0 : index
    %401 = vector.load %arg12[%c1_193, %c0_194, %c0_195] : memref<2x32x64xf32, #tpu.memory_space<vmem>>, vector<1x32x64xf32>
    %402 = vector.shape_cast %401 : vector<1x32x64xf32> to vector<32x64xf32>
    %cst_196 = arith.constant dense<0.000000e+00> : vector<9x64xf32>
    %403 = tpu.matmul %400, %402, %cst_196 {dimension_numbers = #tpu.dot_dimension_numbers<[1], [0], [0], [1], [0, 0, 1, 1], [], []>} : vector<9x32xf32>, vector<32x64xf32>, vector<9x64xf32> -> vector<9x64xf32>
    %c1_197 = arith.constant 1 : index
    %c0_198 = arith.constant 0 : index
    %c0_199 = arith.constant 0 : index
    %404 = vector.load %arg13[%c1_197, %c0_198, %c0_199] : memref<2x1x64xf32, #tpu.memory_space<vmem>>, vector<1x1x64xf32>
    %405 = vector.shape_cast %404 : vector<1x1x64xf32> to vector<1x64xf32>
    %406 = vector.broadcast %405 : vector<1x64xf32> to vector<9x64xf32>
    %407 = arith.addf %403, %406 : vector<9x64xf32>
    %cst_200 = arith.constant 5.000000e-01 : f32
    %408 = vector.broadcast %cst_200 : f32 to vector<9x64xf32>
    %409 = arith.mulf %408, %407 : vector<9x64xf32>
    %cst_201 = arith.constant 4.471500e-02 : f32
    %410 = vector.broadcast %cst_201 : f32 to vector<9x64xf32>
    %411 = arith.mulf %410, %407 : vector<9x64xf32>
    %412 = arith.mulf %411, %407 : vector<9x64xf32>
    %413 = arith.mulf %412, %407 : vector<9x64xf32>
    %414 = arith.addf %407, %413 : vector<9x64xf32>
    %cst_202 = arith.constant 0.797884583 : f32
    %415 = vector.broadcast %cst_202 : f32 to vector<9x64xf32>
    %416 = arith.mulf %415, %414 : vector<9x64xf32>
    %417 = math.tanh %416 : vector<9x64xf32>
    %cst_203 = arith.constant 1.000000e+00 : f32
    %418 = vector.broadcast %cst_203 : f32 to vector<9x64xf32>
    %419 = arith.addf %418, %417 : vector<9x64xf32>
    %420 = arith.mulf %409, %419 : vector<9x64xf32>
    %c1_204 = arith.constant 1 : index
    %c0_205 = arith.constant 0 : index
    %c0_206 = arith.constant 0 : index
    %421 = vector.load %arg14[%c1_204, %c0_205, %c0_206] : memref<2x64x32xf32, #tpu.memory_space<vmem>>, vector<1x64x32xf32>
    %422 = vector.shape_cast %421 : vector<1x64x32xf32> to vector<64x32xf32>
    %cst_207 = arith.constant dense<0.000000e+00> : vector<9x32xf32>
    %423 = tpu.matmul %420, %422, %cst_207 {dimension_numbers = #tpu.dot_dimension_numbers<[1], [0], [0], [1], [0, 0, 1, 1], [], []>} : vector<9x64xf32>, vector<64x32xf32>, vector<9x32xf32> -> vector<9x32xf32>
    %c1_208 = arith.constant 1 : index
    %c0_209 = arith.constant 0 : index
    %c0_210 = arith.constant 0 : index
    %424 = vector.load %arg15[%c1_208, %c0_209, %c0_210] : memref<2x1x32xf32, #tpu.memory_space<vmem>>, vector<1x1x32xf32>
    %425 = vector.shape_cast %424 : vector<1x1x32xf32> to vector<1x32xf32>
    %426 = vector.broadcast %425 : vector<1x32xf32> to vector<9x32xf32>
    %427 = arith.addf %423, %426 : vector<9x32xf32>
    %428 = arith.addf %400, %427 : vector<9x32xf32>
    %c1_211 = arith.constant 1 : index
    %c0_212 = arith.constant 0 : index
    %c0_213 = arith.constant 0 : index
    %429 = vector.load %arg16[%c1_211, %c0_212, %c0_213] : memref<2x1x32xf32, #tpu.memory_space<vmem>>, vector<1x1x32xf32>
    %430 = vector.shape_cast %429 : vector<1x1x32xf32> to vector<1x32xf32>
    %c1_214 = arith.constant 1 : index
    %c0_215 = arith.constant 0 : index
    %c0_216 = arith.constant 0 : index
    %431 = vector.load %arg17[%c1_214, %c0_215, %c0_216] : memref<2x1x32xf32, #tpu.memory_space<vmem>>, vector<1x1x32xf32>
    %432 = vector.shape_cast %431 : vector<1x1x32xf32> to vector<1x32xf32>
    %cst_217 = arith.constant dense<0.000000e+00> : vector<9xf32>
    %433 = vector.multi_reduction <add>, %428, %cst_217 [1] : vector<9x32xf32> to vector<9xf32>
    %434 = vector.shape_cast %433 : vector<9xf32> to vector<9x1xf32>
    %cst_218 = arith.constant 3.200000e+01 : f32
    %435 = vector.broadcast %cst_218 : f32 to vector<9x1xf32>
    %436 = arith.divf %434, %435 : vector<9x1xf32>
    %437 = vector.broadcast %436 : vector<9x1xf32> to vector<9x32xf32>
    %438 = arith.subf %428, %437 : vector<9x32xf32>
    %439 = arith.mulf %438, %438 : vector<9x32xf32>
    %cst_219 = arith.constant dense<0.000000e+00> : vector<9xf32>
    %440 = vector.multi_reduction <add>, %439, %cst_219 [1] : vector<9x32xf32> to vector<9xf32>
    %441 = vector.shape_cast %440 : vector<9xf32> to vector<9x1xf32>
    %cst_220 = arith.constant 3.200000e+01 : f32
    %442 = vector.broadcast %cst_220 : f32 to vector<9x1xf32>
    %443 = arith.divf %441, %442 : vector<9x1xf32>
    %444 = vector.broadcast %436 : vector<9x1xf32> to vector<9x32xf32>
    %445 = arith.subf %428, %444 : vector<9x32xf32>
    %cst_221 = arith.constant 9.99999996E-13 : f32
    %446 = vector.broadcast %cst_221 : f32 to vector<9x1xf32>
    %447 = arith.addf %443, %446 : vector<9x1xf32>
    %448 = math.rsqrt %447 : vector<9x1xf32>
    %449 = vector.broadcast %448 : vector<9x1xf32> to vector<9x32xf32>
    %450 = arith.mulf %445, %449 : vector<9x32xf32>
    %451 = vector.broadcast %430 : vector<1x32xf32> to vector<9x32xf32>
    %452 = arith.mulf %450, %451 : vector<9x32xf32>
    %453 = vector.broadcast %432 : vector<1x32xf32> to vector<9x32xf32>
    %454 = arith.addf %452, %453 : vector<9x32xf32>
    %c0_222 = arith.constant 0 : index
    %c0_223 = arith.constant 0 : index
    %455 = vector.load %arg18[%c0_222, %c0_223] : memref<32x128xf32, #tpu.memory_space<vmem>>, vector<32x128xf32>
    %cst_224 = arith.constant dense<0.000000e+00> : vector<9x128xf32>
    %456 = tpu.matmul %454, %455, %cst_224 {dimension_numbers = #tpu.dot_dimension_numbers<[1], [0], [0], [1], [0, 0, 1, 1], [], []>} : vector<9x32xf32>, vector<32x128xf32>, vector<9x128xf32> -> vector<9x128xf32>
    %c0_225 = arith.constant 0 : index
    %c0_226 = arith.constant 0 : index
    %457 = vector.load %arg19[%c0_225, %c0_226] : memref<1x128xf32, #tpu.memory_space<vmem>>, vector<1x128xf32>
    %458 = vector.broadcast %457 : vector<1x128xf32> to vector<9x128xf32>
    %459 = arith.addf %456, %458 : vector<9x128xf32>
    %c0_227 = arith.constant 0 : index
    %c0_228 = arith.constant 0 : index
    %c0_229 = arith.constant 0 : index
    %460 = vector.load %arg20[%c0_227, %c0_228, %c0_229] : memref<1x9x128xf32, #tpu.memory_space<vmem>>, vector<1x9x128xf32>
    %461 = vector.shape_cast %460 : vector<1x9x128xf32> to vector<9x128xf32>
    %462 = vector.shape_cast %459 : vector<9x128xf32> to vector<1x9x128xf32>
    tpu.vector_store %arg20[%c0_227, %c0_228, %c0_229], %462 {strides = array<i32>} : memref<1x9x128xf32, #tpu.memory_space<vmem>>, vector<1x9x128xf32>,
    return
  }
  func.func @transform_0(%arg0: i32) -> (i32, i32, i32) {
    %c0_i32 = arith.constant 0 : i32
    %c0_i32_0 = arith.constant 0 : i32
    %c0_i32_1 = arith.constant 0 : i32
    return %arg0, %c0_i32, %c0_i32_0 : i32, i32, i32
  }
  func.func @transform_1(%arg0: i32) -> (i32, i32) {
    %c0_i32 = arith.constant 0 : i32
    %c0_i32_0 = arith.constant 0 : i32
    %c0_i32_1 = arith.constant 0 : i32
    return %c0_i32, %c0_i32_0 : i32, i32
  }
  func.func @transform_2(%arg0: i32) -> (i32, i32) {
    %c0_i32 = arith.constant 0 : i32
    %c0_i32_0 = arith.constant 0 : i32
    %c0_i32_1 = arith.constant 0 : i32
    return %c0_i32, %c0_i32_0 : i32, i32
  }
  func.func @transform_3(%arg0: i32) -> (i32, i32) {
    %c0_i32 = arith.constant 0 : i32
    %c0_i32_0 = arith.constant 0 : i32
    %c0_i32_1 = arith.constant 0 : i32
    return %c0_i32, %c0_i32_0 : i32, i32
  }
  func.func @transform_4(%arg0: i32) -> (i32, i32) {
    %c0_i32 = arith.constant 0 : i32
    %c0_i32_0 = arith.constant 0 : i32
    %c0_i32_1 = arith.constant 0 : i32
    return %c0_i32, %c0_i32_0 : i32, i32
  }
  func.func @transform_5(%arg0: i32) -> (i32, i32, i32, i32) {
    %c0_i32 = arith.constant 0 : i32
    %c0_i32_0 = arith.constant 0 : i32
    %c0_i32_1 = arith.constant 0 : i32
    %c0_i32_2 = arith.constant 0 : i32
    %c0_i32_3 = arith.constant 0 : i32
    return %c0_i32, %c0_i32_0, %c0_i32_1, %c0_i32_2 : i32, i32, i32, i32
  }
  func.func @transform_6(%arg0: i32) -> (i32, i32, i32, i32) {
    %c0_i32 = arith.constant 0 : i32
    %c0_i32_0 = arith.constant 0 : i32
    %c0_i32_1 = arith.constant 0 : i32
    %c0_i32_2 = arith.constant 0 : i32
    %c0_i32_3 = arith.constant 0 : i32
    return %c0_i32, %c0_i32_0, %c0_i32_1, %c0_i32_2 : i32, i32, i32, i32
  }
  func.func @transform_7(%arg0: i32) -> (i32, i32, i32) {
    %c0_i32 = arith.constant 0 : i32
    %c0_i32_0 = arith.constant 0 : i32
    %c0_i32_1 = arith.constant 0 : i32
    %c0_i32_2 = arith.constant 0 : i32
    return %c0_i32, %c0_i32_0, %c0_i32_1 : i32, i32, i32
  }
  func.func @transform_8(%arg0: i32) -> (i32, i32, i32) {
    %c0_i32 = arith.constant 0 : i32
    %c0_i32_0 = arith.constant 0 : i32
    %c0_i32_1 = arith.constant 0 : i32
    %c0_i32_2 = arith.constant 0 : i32
    return %c0_i32, %c0_i32_0, %c0_i32_1 : i32, i32, i32
  }
  func.func @transform_9(%arg0: i32) -> (i32, i32, i32) {
    %c0_i32 = arith.constant 0 : i32
    %c0_i32_0 = arith.constant 0 : i32
    %c0_i32_1 = arith.constant 0 : i32
    %c0_i32_2 = arith.constant 0 : i32
    return %c0_i32, %c0_i32_0, %c0_i32_1 : i32, i32, i32
  }
  func.func @transform_10(%arg0: i32) -> (i32, i32, i32) {
    %c0_i32 = arith.constant 0 : i32
    %c0_i32_0 = arith.constant 0 : i32
    %c0_i32_1 = arith.constant 0 : i32
    %c0_i32_2 = arith.constant 0 : i32
    return %c0_i32, %c0_i32_0, %c0_i32_1 : i32, i32, i32
  }
  func.func @transform_11(%arg0: i32) -> (i32, i32, i32) {
    %c0_i32 = arith.constant 0 : i32
    %c0_i32_0 = arith.constant 0 : i32
    %c0_i32_1 = arith.constant 0 : i32
    %c0_i32_2 = arith.constant 0 : i32
    return %c0_i32, %c0_i32_0, %c0_i32_1 : i32, i32, i32
  }
  func.func @transform_12(%arg0: i32) -> (i32, i32, i32) {
    %c0_i32 = arith.constant 0 : i32
    %c0_i32_0 = arith.constant 0 : i32
    %c0_i32_1 = arith.constant 0 : i32
    %c0_i32_2 = arith.constant 0 : i32
    return %c0_i32, %c0_i32_0, %c0_i32_1 : i32, i32, i32
  }
  func.func @transform_13(%arg0: i32) -> (i32, i32, i32) {
    %c0_i32 = arith.constant 0 : i32
    %c0_i32_0 = arith.constant 0 : i32
    %c0_i32_1 = arith.constant 0 : i32
    %c0_i32_2 = arith.constant 0 : i32
    return %c0_i32, %c0_i32_0, %c0_i32_1 : i32, i32, i32
  }
  func.func @transform_14(%arg0: i32) -> (i32, i32, i32) {
    %c0_i32 = arith.constant 0 : i32
    %c0_i32_0 = arith.constant 0 : i32
    %c0_i32_1 = arith.constant 0 : i32
    %c0_i32_2 = arith.constant 0 : i32
    return %c0_i32, %c0_i32_0, %c0_i32_1 : i32, i32, i32
  }
  func.func @transform_15(%arg0: i32) -> (i32, i32, i32) {
    %c0_i32 = arith.constant 0 : i32
    %c0_i32_0 = arith.constant 0 : i32
    %c0_i32_1 = arith.constant 0 : i32
    %c0_i32_2 = arith.constant 0 : i32
    return %c0_i32, %c0_i32_0, %c0_i32_1 : i32, i32, i32
  }
  func.func @transform_16(%arg0: i32) -> (i32, i32, i32) {
    %c0_i32 = arith.constant 0 : i32
    %c0_i32_0 = arith.constant 0 : i32
    %c0_i32_1 = arith.constant 0 : i32
    %c0_i32_2 = arith.constant 0 : i32
    return %c0_i32, %c0_i32_0, %c0_i32_1 : i32, i32, i32
  }
  func.func @transform_17(%arg0: i32) -> (i32, i32) {
    %c0_i32 = arith.constant 0 : i32
    %c0_i32_0 = arith.constant 0 : i32
    %c0_i32_1 = arith.constant 0 : i32
    return %c0_i32, %c0_i32_0 : i32, i32
  }
  func.func @transform_18(%arg0: i32) -> (i32, i32) {
    %c0_i32 = arith.constant 0 : i32
    %c0_i32_0 = arith.constant 0 : i32
    %c0_i32_1 = arith.constant 0 : i32
    return %c0_i32, %c0_i32_0 : i32, i32
  }
  func.func @transform_19(%arg0: i32) -> (i32, i32, i32) {
    %c0_i32 = arith.constant 0 : i32
    %c0_i32_0 = arith.constant 0 : i32
    %c0_i32_1 = arith.constant 0 : i32
    return %arg0, %c0_i32, %c0_i32_0 : i32, i32, i32
  }
}

</mosaic_0001>

<bundles_post_ra>
// kernel: forward.1
= control target key start
LH: loop header
LB: loop body
LE: loop exit
PB: predicated region body
PF: predicated region fallthrough
CT: control target
= control target key end

     0   :  { %s4203_s0 = inlined_call_operand.vmem [shape: f32[2,9,16], index: 0, kind: input, shape index: {}]   ;;  %s4204_s1 = inlined_call_operand.vmem [shape: f32[9,32], index: 1, kind: input, shape index: {}]   ;;  %s4205_s2 = inlined_call_operand.hbm [shape: f32[16,32], index: 2, kind: input, shape index: {}]   ;;  %s4206_s3 = inlined_call_operand.hbm [shape: f32[1,32], index: 3, kind: input, shape index: {}]   ;;  %s4207_s4 = inlined_call_operand.hbm [shape: f32[1,32], index: 4, kind: input, shape index: {}]   ;;  %s4208_s5 = inlined_call_operand.vmem [shape: f32[2,3,32,32], index: 5, kind: input, shape index: {}]   ;;  %s4209_s6 = inlined_call_operand.hbm [shape: f32[2,3,1,32], index: 6, kind: input, shape index: {}]   ;;  %s4210_s7 = inlined_call_operand.hbm [shape: f32[2,32,32], index: 7, kind: input, shape index: {}]   ;;  %s4211_s8 = inlined_call_operand.vmem [shape: f32[2,1,32], index: 8, kind: input, shape index: {}]   ;;  %s4212_s9 = inlined_call_operand.hbm [shape: f32[2,1,32], index: 9, kind: input, shape index: {}]   ;;  %s4213_s10 = inlined_call_operand.hbm [shape: f32[2,1,32], index: 10, kind: input, shape index: {}]   ;;  %s4214_s11 = inlined_call_operand.hbm [shape: f32[2,32,64], index: 11, kind: input, shape index: {}]   ;;  %s4215_s12 = inlined_call_operand.hbm [shape: f32[2,1,64], index: 12, kind: input, shape index: {}]   ;;  %s4216_s13 = inlined_call_operand.vmem [shape: f32[2,64,32], index: 13, kind: input, shape index: {}]   ;;  %s4217_s14 = inlined_call_operand.hbm [shape: f32[2,1,32], index: 14, kind: input, shape index: {}]   ;;  %s4218_s15 = inlined_call_operand.hbm [shape: f32[2,1,32], index: 15, kind: input, shape index: {}]   ;;  %s4219_s16 = inlined_call_operand.hbm [shape: f32[2,1,32], index: 16, kind: input, shape index: {}]   ;;  %s4220_s17 = inlined_call_operand.vmem [shape: f32[32,128], index: 17, kind: input, shape index: {}]   ;;  %s4221_s18 = inlined_call_operand.hbm [shape: f32[1,128], index: 18, kind: input, shape index: {}]   ;;  %s4222_s19 = inlined_call_operand.vmem [shape: f32[2,9,128], index: 19, kind: output, shape index: {}]  }
   0x1   :  { %4229 = sst [smem:[#allocation30_spill]] %s4203_s0 }
   0x2   :  { %4230 = sst [smem:[#allocation31_spill]] %s4204_s1 }
   0x3   :  { %4231 = sst [smem:[#allocation32_spill]] %s4205_s2 }
   0x4   :  { %4232 = sst [smem:[#allocation33_spill]] %s4206_s3 }
   0x5   :  { %4233 = sst [smem:[#allocation34_spill]] %s4209_s6 }
   0x6   :  { %4234 = sst [smem:[#allocation35_spill]] %s4212_s9 }
   0x7   :  { %4235 = sst [smem:[#allocation36_spill]] %s4214_s11 }
   0x8   :  { %4236 = sst [smem:[#allocation37_spill]] %s4217_s14 }
   0x9   :  { %24 = vsyncpa [#allocation3], 0 }
   0xa   :  { %25 = vsyncpa [#allocation5], 0 }
   0xb   :  { %26 = vsyncpa [#allocation8], 0 }
   0xc   :  { %27 = vsyncpa [#allocation11], 0 }
   0xd   :  { %28 = vsyncpa [#allocation14], 0 }
   0xe   :  { %29 = vsyncpa [#allocation17], 0 }
   0xf   :  { %30 = vsyncpa [#allocation20], 0  ;;  %s3578_s0 = smov 0  }
  0x10 LB: > { %4237 = sst [smem:[#allocation29_spill]] %s3458_s0  ;;  %s3587_s22 = sadd.s32 4294967295, %s3458_s0   ;;  %s3458_s0 = sphi %s3578_s0, %s36_s0  }
  0x11   : > { %s4238_s21 = sld [smem:[#allocation33_spill]]  ;;  %p2609_p0 = scmp.ge.s32.totalorder %s3458_s0, 1 }
  0x12   : > { %p471_p1 = scmp.lt.s32.totalorder %s3458_s0, 3  ;;  %p2865_p2 = scmp.eq.s32.totalorder %s3587_s22, 0 }
  0x13   : > { %s3460_s23 = smov [#allocation4]   ;;  %s4240_s6 = sld [smem:[#allocation34_spill]] }
  0x14   : > { %p3592_p3 = pnand %p2609_p0, %p471_p1  ;;  %s502_s24 = sshll.u32 %s3460_s23, 4  ;;  %s503_s24 = int_to_ptr.vmem [resolvable:$true] %s502_s24 }
  0x15   : > { %s3461_s28 = smov [#allocation7]   ;;  %s4242_s9 = sld [smem:[#allocation35_spill]] }
  0x16   : > { %p2825_p4 = pneg %p3592_p3  ;;  %s528_s29 = sshll.u32 %s3461_s28, 4  ;;  %s529_s29 = int_to_ptr.vmem [resolvable:$true] %s528_s29 }
  0x17   : > { %s500_s1 = sshll.u32 %s4238_s21, 4  ;;  %s4227_s23 = smov 16   ;;  %s501_s1 = int_to_ptr.hbm [resolvable:$true] %s500_s1 }
  0x18   : > { %p3603_p5 = pnand %p2865_p2, %p2825_p4  ;;  %s3463_s25 = smov 1  }
  0x19   : > { %s526_s26 = sshll.u32 %s4240_s6, 4  ;;  %s3464_s3 = smov [#allocation10]   ;;  %s527_s26 = int_to_ptr.hbm [resolvable:$true] %s526_s26 }
  0x1a   : > { %2831 = dma.hbm_to_vmem [thread:$0]  (!%p3603_p5), %s501_s1, 16, %s503_s24, [#allocation5]  }
  0x1b   : > { %s557_s21 = sshll.u32 %s4242_s9, 4  ;;  %s559_s6 = sshll.u32 %s3464_s3, 4  ;;  %s558_s21 = int_to_ptr.hbm [resolvable:$true] %s557_s21  ;;  %s560_s6 = int_to_ptr.vmem [resolvable:$true] %s559_s6 }
  0x1c   : > { %2837 = dma.hbm_to_vmem [thread:$0]  (!%p3603_p5), %s527_s26, 96, %s529_s29, [#allocation8], %s4227_s23, %s4227_s23, %s3463_s25  }
  0x1d   : > { %2843 = dma.hbm_to_vmem [thread:$0]  (!%p3603_p5), %s558_s21, 32, %s560_s6, [#allocation11], %s4227_s23, %s4227_s23, %s3463_s25  }
  0x1e   : > { %s4243_s11 = sld [smem:[#allocation36_spill]]  ;;  %s3465_s24 = smov [#allocation13]  }
  0x1f   : > { %s587_s20 = sshll.u32 %s3465_s24, 4  ;;  %s4244_s14 = sld [smem:[#allocation37_spill]]  ;;  %s588_s20 = int_to_ptr.vmem [resolvable:$true] %s587_s20 }
  0x20   : > { %s4225_s3 = smov 128   ;;  %s3467_s0 = smov 8  }
  0x21   : > { %s3468_s6 = smov [#allocation16]   ;;  %s644_s24 = sshll.u32 %s4219_s16, 4  ;;  %s645_s24 = int_to_ptr.hbm [resolvable:$true] %s644_s24 }
  0x22   : > { %s618_s21 = sshll.u32 %s3468_s6, 4  ;;  %s3470_s6 = smov [#allocation2]   ;;  %s619_s21 = int_to_ptr.vmem [resolvable:$true] %s618_s21 }
  0x23   : > { %s487_s28 = sshll.u32 %s3470_s6, 4  ;;  %s540_s26 = sshll.u32 %s4210_s7, 4  ;;  %s488_s28 = int_to_ptr.vmem [resolvable:$true] %s487_s28  ;;  %s541_s26 = int_to_ptr.hbm [resolvable:$true] %s540_s26 }
  0x24   : > { %s585_s1 = sshll.u32 %s4243_s11, 4  ;;  %s4245_s11 = sld [smem:[#allocation32_spill]]  ;;  %s586_s1 = int_to_ptr.hbm [resolvable:$true] %s585_s1 }
  0x25   : > { %s616_s29 = sshll.u32 %s4244_s14, 4  ;;  %s3473_s9 = smov [#allocation12]   ;;  %s617_s29 = int_to_ptr.hbm [resolvable:$true] %s616_s29 }
  0x26   : > { %2849 = dma.hbm_to_vmem [thread:$0]  (!%p3603_p5), %s586_s1, 1024, %s588_s20, [#allocation14], %s4225_s3, %s4225_s3, %s3467_s0  }
  0x27   : > { %2855 = dma.hbm_to_vmem [thread:$0]  (!%p3603_p5), %s617_s29, 32, %s619_s21, [#allocation17], %s4227_s23, %s4227_s23, %s3463_s25  }
  0x28   : > { %s3469_s1 = smov [#allocation19]   ;;  %s512_s29 = sshll.u32 %s4207_s4, 4  ;;  %s513_s29 = int_to_ptr.hbm [resolvable:$true] %s512_s29 }
  0x29   : > { %s646_s20 = sshll.u32 %s3469_s1, 4  ;;  %s3471_s1 = smov [#allocation6]   ;;  %s647_s20 = int_to_ptr.vmem [resolvable:$true] %s646_s20 }
  0x2a   : > { %s485_s14 = sshll.u32 %s4245_s11, 4  ;;  %s4246_s11 = smov 128   ;;  %s486_s14 = int_to_ptr.hbm [resolvable:$true] %s485_s14 }
  0x2b   : > { %2861 = dma.hbm_to_vmem [thread:$0]  (!%p3603_p5), %s645_s24, 32, %s647_s20, [#allocation20], %s4227_s23, %s4227_s23, %s3463_s25  }
  0x2c   : > { %2828 = dma.hbm_to_vmem [thread:$0]  (!%p3603_p5), %s486_s14, 256, %s488_s28, [#allocation3], %s4246_s11, %s4246_s11, %s3467_s0  }
  0x2d   : > { %s514_s24 = sshll.u32 %s3471_s1, 4  ;;  %s3472_s3 = smov [#allocation9]   ;;  %s515_s24 = int_to_ptr.vmem [resolvable:$true] %s514_s24 }
  0x2e   : > { %2834 = dma.hbm_to_vmem [thread:$0]  (!%p3603_p5), %s513_s29, 16, %s515_s24, [#allocation5]  }
  0x2f   : > { %s542_s20 = sshll.u32 %s3472_s3, 4  ;;  %s571_s23 = sshll.u32 %s4213_s10, 4  ;;  %s543_s20 = int_to_ptr.vmem [resolvable:$true] %s542_s20  ;;  %s572_s23 = int_to_ptr.hbm [resolvable:$true] %s571_s23 }
  0x30   : > { %2840 = dma.hbm_to_vmem [thread:$0]  (!%p3603_p5), %s541_s26, 1024, %s543_s20, [#allocation8], %s4246_s11, %s4246_s11, %s3467_s0  }
  0x31   : > { %s599_s21 = sshll.u32 %s4215_s12, 4  ;;  %s573_s29 = sshll.u32 %s3473_s9, 4  ;;  %s600_s21 = int_to_ptr.hbm [resolvable:$true] %s599_s21  ;;  %s574_s29 = int_to_ptr.vmem [resolvable:$true] %s573_s29 }
  0x32   : > { %s4247_s1 = smov 16   ;;  %s3474_s24 = smov [#allocation15]  }
  0x33   : > { %2846 = dma.hbm_to_vmem [thread:$0]  (!%p3603_p5), %s572_s23, 32, %s574_s29, [#allocation11], %s4247_s1, %s4247_s1, %s3463_s25  }
  0x34   : > { %s601_s3 = sshll.u32 %s3474_s24, 4  ;;  %s630_s0 = sshll.u32 %s4218_s15, 4  ;;  %s602_s3 = int_to_ptr.vmem [resolvable:$true] %s601_s3  ;;  %s631_s0 = int_to_ptr.hbm [resolvable:$true] %s630_s0 }
  0x35   : > { %2852 = dma.hbm_to_vmem [thread:$0]  (!%p3603_p5), %s600_s21, 32, %s602_s3, [#allocation14], %s4247_s1, %s4247_s1, %s3463_s25  }
  0x36   : > { %s662_s20 = sshll.u32 %s4221_s18, 4  ;;  %s3475_s14 = smov [#allocation18]   ;;  %s663_s20 = int_to_ptr.hbm [resolvable:$true] %s662_s20 }
  0x37   : > { %s632_s23 = sshll.u32 %s3475_s14, 4  ;;  %s3476_s28 = smov [#allocation21]   ;;  %s633_s23 = int_to_ptr.vmem [resolvable:$true] %s632_s23 }
  0x38   : > { %2858 = dma.hbm_to_vmem [thread:$0]  (!%p3603_p5), %s631_s0, 32, %s633_s23, [#allocation17], %s4247_s1, %s4247_s1, %s3463_s25  }
  0x39   : > { %s664_s9 = sshll.u32 %s3476_s28, 4  ;;  %685 = sbr.rel (%p3592_p3) target bundleno = 4671 (0x123f), region = 96  ;;  %s665_s9 = int_to_ptr.vmem [resolvable:$true] %s664_s9 }
  0x3a   : > { %2864 = dma.hbm_to_vmem [thread:$0]  (!%p3603_p5), %s663_s20, 16, %s665_s9, [#allocation20]  }
  0x3e   : > { %3429 = dma.done.wait (%p2865_p2), [#allocation3], 256  }
  0x3f   : > { %3431 = vsyncadd (%p2865_p2), [#allocation3], 4294967040 }
  0x40   : > { %3433 = dma.done.wait (%p2865_p2), [#allocation5], 32  }
  0x41   : > { %3435 = vsyncadd (%p2865_p2), [#allocation5], 4294967264 }
  0x42   : > { %3437 = dma.done.wait (%p2865_p2), [#allocation8], 1120  }
  0x43   : > { %3439 = vsyncadd (%p2865_p2), [#allocation8], 4294966176 }
  0x44   : > { %3441 = dma.done.wait (%p2865_p2), [#allocation11], 64  }
  0x45   : > { %3443 = vsyncadd (%p2865_p2), [#allocation11], 4294967232 }
  0x46   : > { %3445 = dma.done.wait (%p2865_p2), [#allocation14], 1056  }
  0x47   : > { %3447 = vsyncadd (%p2865_p2), [#allocation14], 4294966240 }
  0x48   : > { %3449 = dma.done.wait (%p2865_p2), [#allocation17], 64  }
  0x49   : > { %3451 = vsyncadd (%p2865_p2), [#allocation17], 4294967232 }
  0x4a   : > { %3453 = dma.done.wait (%p2865_p2), [#allocation20], 48  }
  0x4b   : > { %3455 = vsyncadd (%p2865_p2), [#allocation20], 4294967248  ;;  %p802_p6 = scmp.lt.s32.totalorder %s3587_s22, 1  ;;  %s4248_s21 = sld [smem:[#allocation30_spill]]  ;;  %v815_v0 = vld [vmem:[#allocation2 + $0x8] sm:$0xff]  ;;  %v814_v1 = vld [vmem:[#allocation2] sm:$0xff] }
  0x4c   : > { %2767 = vmatpush.msra.mxu3 %v815_v0  ;;  %vm818_vm0 = vcmask 130048   ;;  %839 = vmatpush.msra.mxu0 %v815_v0  ;;  %s4249_s3 = sld [smem:[#allocation31_spill]]  ;;  %vm854_vm1 = vcmask 253952   ;;  %vm850_vm2 = vcmask 261120   ;;  %v3477_v12 = vmov 32.0   ;;  %v930_v29 = vld [vmem:[%s4208_s5 + $0x18] sm:$0xff] }
  0x4d   : > { %s4258_s22 = smov (!%p802_p6, %s3587_s22), 1  ;;  %2940 = vrcp.f32 %v3477_v12  ;;  %2769 = vmatpush.msra.mxu2 %v930_v29  ;;  %953 = vmatpush.msra.mxu1 %v930_v29  ;;  %v929_v30 = vld [vmem:[%s4208_s5 + $0x10] sm:$0xff]  ;;  %v928_v31 = vld [vmem:[%s4208_s5 + $0x8] sm:$0xff]  ;;  %v927_v32 = vld [vmem:[%s4208_s5] sm:$0xff]  ;;  %vm1162_vm12 = vcmask 1040384  }
  0x4e   : > { %s2765_s2 = sshll.u32 %s4258_s22, 4  ;;  %2768 = vmatpush.msra.mxu3 %v814_v1  ;;  %840 = vmatpush.msra.mxu0 %v814_v1  ;;  %v2649_v33 = vld [vmem:[%s4208_s5 + $0x38] sm:$0xff]  ;;  %v2648_v35 = vld [vmem:[%s4208_s5 + $0x30] sm:$0xff]  ;;  %v2647_v37 = vld [vmem:[%s4208_s5 + $0x28] sm:$0xff] }
  0x4f   : > { %2770 = vmatpush.msra.mxu2 %v929_v30  ;;  %954 = vmatpush.msra.mxu1 %v929_v30  ;;  %v2655_v34 = vld [vmem:[%s4208_s5 + $0x58] sm:$0xff]  ;;  %v2654_v36 = vld [vmem:[%s4208_s5 + $0x50] sm:$0xff]  ;;  %v2653_v39 = vld [vmem:[%s4208_s5 + $0x48] sm:$0xff]  ;;  %s811_s6 = scalar_lea.vmem %s4222_s19, %s2765_s2 }
  0x50   : > { %1019 = vmatpush.msrb.mxu3 %v2655_v34  ;;  %v2646_v41 = vld [vmem:[%s4208_s5 + $0x20] sm:$0xff]  ;;  %v2917_v55 = vld [vmem:[#allocation4] ss:$0 sm:$0xff]  ;;  %v2918_v59 = vld [vmem:[#allocation6] ss:$0 sm:$0xff] }
  0x51   : > { %s806_s29 = scalar_lea.vmem %s4248_s21, %s2765_s2  ;;  %2771 = vmatpush.msra.mxu2 %v928_v31  ;;  %955 = vmatpush.msra.mxu1 %v928_v31  ;;  %v2652_v42 = vld [vmem:[%s4208_s5 + $0x40] sm:$0xff] }
  0x52   : > { %v813_v2 = vld [vmem:[%s806_s29 + $0x8] sm:$0x1]  ;;  %v812_v3 = vld [vmem:[%s806_s29] sm:$0xff]  ;;  %1020 = vmatpush.msrb.mxu3 %v2654_v36 }
  0x53   : > { %2643 = vmatmul.msk.f32.vlgmr.msra.gmra.mxu3 %vm818_vm0, %v813_v2  ;;  %2642 = vmatmul.msk.f32.vlgmr.msra.gmra.mxu0 %vm818_vm0, %v812_v3  ;;  %v817_v4 = vld [vmem:[%s4249_s3 + $0x8] sm:$0x1]  ;;  %v816_v7 = vld [vmem:[%s4249_s3] sm:$0xff]  ;;  %v2941_v13 = vpop.eup %2940 }
  0x54   : > { %v859_v14 = vmul.f32 32.0, %v2941_v13  ;;  %vm863_vm3 = vweird.f32 %v2941_v13  ;;  %2772 = vmatpush.msra.mxu2 %v927_v32  ;;  %956 = vmatpush.msra.mxu1 %v927_v32 }
  0x55   : > { %1021 = vmatpush.msrb.mxu3 %v2653_v39 }
  0x56   : > { %v860_v15 = vsub.f32 1.0, %v859_v14  ;;  %986 = vmatpush.msrb.mxu2 %v2649_v33 }
  0x57   : > { %1022 = vmatpush.msrb.mxu3 %v2652_v42 }
  0x58   : > { %v861_v16 = vmul.f32 %v2941_v13, %v860_v15  ;;  %987 = vmatpush.msrb.mxu2 %v2648_v35 }
  0x5a   : > { %v862_v17 = vadd.f32 %v2941_v13, %v861_v16  ;;  %988 = vmatpush.msrb.mxu2 %v2647_v37 }
  0x5c   : > { %v3744_v18 = vsel %vm863_vm3, %v2941_v13, %v862_v17  ;;  %989 = vmatpush.msrb.mxu2 %v2646_v41 }
  0xd0   : > { %v842_v8 = vpop.f32.mrf.mxu0 }
  0xd1   : > { %v843_v10 = vadd.f32 %v842_v8, %v816_v7  ;;  %v913_v7 = vlaneseq }
  0xd3   : > { %v851_v11 = vsel %vm850_vm2, %v843_v10, 0.0 }
  0xd6   : > { %v845_v5 = vpop.f32.mrf.mxu3 }
  0xd7   : > { %v846_v6 = vadd.f32 %v845_v5, %v817_v4 }
  0xd9   : > { %v855_v9 = vsel %vm854_vm1, %v846_v6, 0.0 }
  0xda   : > { %856 = vadd.xlane.f32.xlu0 %v855_v9  ;;  %v3809_v9 = vand.u32 127, %v913_v7 }
  0xdc   : > { %vm918_vm10 = vcmp.ge.s32.totalorder %v3809_v9, 8  ;;  %vm919_vm11 = vcmp.lt.s32.totalorder %v3809_v9, 16  ;;  %vm916_vm14 = vcmp.lt.s32.totalorder %v3809_v9, 8  ;;  %vm924_vm15 = vcmp.ge.s32.totalorder %v3809_v9, 24 }
  0xdd   : > { %vm3815_vm13 = vmand %vm918_vm10, %vm919_vm11  ;;  %vm925_vm0 = vcmp.lt.s32.totalorder %v3809_v9, 32  ;;  %vm921_vm3 = vcmp.ge.s32.totalorder %v3809_v9, 16 }
  0xe2   : > { %852 = vadd.xlane.f32.xlu0 %v851_v11  ;;  %v2921_v11 = vld [vmem:[#allocation7 + $0x2] ss:$0 sm:$0xff] }
 0x14d   : > { %v857_v19 = vpop.xlane.xlu0 %856 }
 0x14e   : > { %v866_v20 = vmul.f32 %v3744_v18, %v857_v19  ;;  %v2919_v19 = vld [vmem:[#allocation7] ss:$0 sm:$0xff] }
 0x150   : > { %v868_v21 = vsub.f32 %v846_v6, %v866_v20 }
 0x152   : > { %v870_v22 = vmul.f32 %v868_v21, %v868_v21 }
 0x154   : > { %v874_v23 = vsel %vm854_vm1, %v870_v22, 0.0 }
 0x155   : > { %875 = vadd.xlane.f32.xlu1 %v874_v23  ;;  %v853_v24 = vpop.xlane.xlu0 %852 }
 0x156   : > { %v865_v25 = vmul.f32 %v3744_v18, %v853_v24 }
 0x158   : > { %v3749_v26 = vsub.f32 %v843_v10, %v865_v25  ;;  %v2920_v10 = vld [vmem:[#allocation7 + $0x1] ss:$0 sm:$0xff] }
 0x15a   : > { %v869_v27 = vmul.f32 %v3749_v26, %v3749_v26 }
 0x15c   : > { %v871_v28 = vsel %vm850_vm2, %v869_v27, 0.0 }
 0x15d   : > { %872 = vadd.xlane.f32.xlu1 %v871_v28 }
 0x1c8   : > { %v876_v38 = vpop.xlane.xlu1 %875 }
 0x1c9   : > { %v878_v40 = vmul.f32 %v876_v38, %v3744_v18 }
 0x1cb   : > { %v880_v43 = vadd.f32 1e-12, %v878_v40 }
 0x1cd   : > { %2942 = vrsqrt.f32 %v880_v43  ;;  %vm897_vm5 = vweird.f32 %v880_v43 }
 0x1d0   : > { %v873_v44 = vpop.xlane.xlu1 %872 }
 0x1d1   : > { %v877_v45 = vmul.f32 %v873_v44, %v3744_v18 }
 0x1d3   : > { %v2943_v46 = vpop.eup %2942  ;;  %v879_v47 = vadd.f32 1e-12, %v877_v45 }
 0x1d4   : > { %v892_v48 = vmul.f32 %v2943_v46, %v880_v43  ;;  %vm898_vm4 = vweird.f32 %v2943_v46 }
 0x1d5   : > { %2944 = vrsqrt.f32 %v879_v47  ;;  %vm899_vm6 = vmor %vm897_vm5, %vm898_vm4  ;;  %vm887_vm8 = vweird.f32 %v879_v47  ;;  %vm922_vm4 = vcmp.lt.s32.totalorder %v3809_v9, 24 }
 0x1d6   : > { %v893_v49 = vmul.f32 %v2943_v46, %v892_v48  ;;  %vm3836_vm5 = vmand %vm924_vm15, %vm925_vm0 }
 0x1d8   : > { %v894_v50 = vmul.f32 0.5, %v893_v49 }
 0x1da   : > { %v895_v51 = vsub.f32 1.5, %v894_v50 }
 0x1db   : > { %v2945_v52 = vpop.eup %2944 }
 0x1dc   : > { %v896_v53 = vmul.f32 %v2943_v46, %v895_v51  ;;  %v882_v54 = vmul.f32 %v2945_v52, %v879_v47  ;;  %vm888_vm7 = vweird.f32 %v2945_v52 }
 0x1dd   : > { %vm889_vm9 = vmor %vm887_vm8, %vm888_vm7  ;;  %vm1073_vm7 = vcmask 72704   ;;  %vm1077_vm8 = vcmask 65536  }
 0x1de   : > { %v900_v56 = vsel %vm899_vm6, %v2943_v46, %v896_v53  ;;  %v883_v57 = vmul.f32 %v2945_v52, %v882_v54  ;;  %vm3844_vm6 = vmand %vm921_vm3, %vm922_vm4  ;;  %vm1569_vm4 = vcmask 523264  }
 0x1df   : > { %v902_v58 = vmul.f32 %v900_v56, %v868_v21 }
 0x1e0   : > { %v884_v60 = vmul.f32 0.5, %v883_v57 }
 0x1e1   : > { %v907_v61 = vmul.f32 %v2917_v55, %v902_v58 }
 0x1e2   : > { %v885_v62 = vsub.f32 1.5, %v884_v60 }
 0x1e3   : > { %v3792_v63 = vadd.f32 %v2918_v59, %v907_v61 }
 0x1e4   : > { %v886_v0 = vmul.f32 %v2945_v52, %v885_v62 }
 0x1e5   : > { %2645 = vmatmul.msk.f32.vlgmr.msra.gmra.mxu2 %vm850_vm2, %v3792_v63 }
 0x1e6   : > { %v890_v1 = vsel %vm889_vm9, %v2945_v52, %v886_v0 }
 0x1e7   : > { %v901_v2 = vmul.f32 %v890_v1, %v3749_v26 }
 0x1e9   : > { %v906_v3 = vmul.f32 %v2917_v55, %v901_v2 }
 0x1eb   : > { %v3797_v4 = vadd.f32 %v2918_v59, %v906_v3 }
 0x1ed   : > { %2644 = vmatmul.msk.f32.vlgmr.msra.gmra.mxu1 %vm850_vm2, %v3797_v4  ;;  %2650 = vmatmul.msk.f32.vlgmr.msrb.gmra.mxu2 %vm850_vm2, %v3797_v4 }
 0x1ee   : > { %2656 = vmatmul.msk.f32.vlgmr.msrb.gmra.mxu3 %vm850_vm2, %v3797_v4 }
 0x1f5   : > { %2651 = vmatmul.msk.f32.gmra.mxu2 %vm850_vm2, %v3792_v63 }
 0x1f6   : > { %2657 = vmatmul.msk.f32.gmra.mxu3 %vm850_vm2, %v3792_v63 }
 0x268   : > { %v961_v5 = vpop.f32.mrf.mxu2 }
 0x269   : > { %v3867_v31 = vadd.f32 %v2919_v19, %v961_v5 }
 0x26a   : > { %v958_v16 = vpop.f32.mrf.mxu1 }
 0x26b   : > { %v3830_v23 = vadd.f32 %v2919_v19, %v958_v16  ;;  %v1033_v32 = vsel %vm916_vm14, %v3867_v31, 0.0  ;;  %v1100_v33 = vsel %vm3815_vm13, %v3867_v31, 0.0  ;;  %v1224_v35 = vsel %vm3844_vm6, %v3867_v31, 0.0 }
 0x26d   : > { %v1032_v29 = vsel %vm916_vm14, %v3830_v23, 0.0  ;;  %v1099_v30 = vsel %vm3815_vm13, %v3830_v23, 0.0  ;;  %v1223_v34 = vsel %vm3844_vm6, %v3830_v23, 0.0 }
 0x270   : > { %v991_v6 = vpop.f32.mrf.mxu2 }
 0x271   : > { %v1024_v8 = vpop.f32.mrf.mxu3  ;;  %v992_v24 = vadd.f32 %v2920_v10, %v991_v6 }
 0x272   : > { %v1025_v22 = vadd.f32 %v2921_v11, %v1024_v8 }
 0x278   : > { %v994_v12 = vpop.f32.mrf.mxu2 }
 0x279   : > { %v995_v13 = vadd.f32 %v2920_v10, %v994_v12  ;;  %v1027_v14 = vpop.f32.mrf.mxu3 }
 0x27a   : > { %v1028_v15 = vadd.f32 %v2921_v11, %v1027_v14 }
 0x27b   : > { %2658 = vmatpush.xpose.msk.msrb.mxu0 %vm850_vm2, %v995_v13  ;;  %2662 = vmatpush.xpose.msk.msrb.mxu1 %vm850_vm2, %v995_v13 }
 0x27c   : > { %v1102_v20 = vsel %vm3815_vm13, %v1028_v15, 0.0  ;;  %v1035_v21 = vsel %vm916_vm14, %v1028_v15, 0.0  ;;  %v1319_v26 = vsel %vm3836_vm5, %v1028_v15, 0.0  ;;  %v1226_v28 = vsel %vm3844_vm6, %v1028_v15, 0.0 }
 0x27d   : > { %2666 = vmatpush.msk.msra.mxu2 %vm1162_vm12, %v1102_v20  ;;  %2670 = vmatpush.msk.msra.mxu3 %vm1162_vm12, %v1035_v21 }
 0x27f   : > { %2667 = vmatpush.msk.msra.mxu2 %vm3815_vm13, %v1025_v22  ;;  %2671 = vmatpush.msk.msra.mxu3 %vm916_vm14, %v1025_v22 }
 0x280   : > { %2659 = vmatpush.xpose.msk.msrb.mxu0 %vm850_vm2, %v992_v24  ;;  %2663 = vmatpush.xpose.msk.msrb.mxu1 %vm850_vm2, %v992_v24 }
 0x281   : > { %2682 = vmatpush.xpose.msk.msrb.mxu2 %vm850_vm2, %v995_v13  ;;  %2686 = vmatpush.msk.msrb.mxu3 %vm1162_vm12, %v1319_v26 }
 0x283   : > { %2687 = vmatpush.msk.msrb.mxu3 %vm3836_vm5, %v1025_v22  ;;  %2660 = vmatmul.msk.f32.vlgmr.msrb.gmra.mxu0 %vm850_vm2, %v1032_v29 }
 0x284   : > { %2674 = vmatpush.xpose.msk.msra.mxu0 %vm850_vm2, %v995_v13  ;;  %2678 = vmatpush.msk.msra.mxu1 %vm1162_vm12, %v1226_v28  ;;  %v1317_v28 = vsel %vm3836_vm5, %v3867_v31, 0.0 }
 0x285   : > { %2664 = vmatmul.msk.f32.vlgmr.msrb.gmra.mxu1 %vm850_vm2, %v1099_v30  ;;  %2683 = vmatpush.xpose.msk.msrb.mxu2 %vm850_vm2, %v992_v24 }
 0x286   : > { %2679 = vmatpush.msk.msra.mxu1 %vm3844_vm6, %v1025_v22  ;;  %v1316_v22 = vsel %vm3836_vm5, %v3830_v23, 0.0 }
 0x288   : > { %2675 = vmatpush.xpose.msk.msra.mxu0 %vm850_vm2, %v992_v24 }
 0x28b   : > { %2661 = vmatmul.msk.f32.gmra.mxu0 %vm850_vm2, %v1033_v32 }
 0x28d   : > { %2665 = vmatmul.msk.f32.gmra.mxu1 %vm850_vm2, %v1100_v33 }
 0x293   : > { %2676 = vmatmul.msk.f32.vlgmr.msra.gmra.mxu0 %vm850_vm2, %v1223_v34 }
 0x29b   : > { %2677 = vmatmul.msk.f32.gmra.mxu0 %vm850_vm2, %v1224_v35 }
 0x300   : > { %v1065_v36 = vpop.f32.mrf.mxu0 }
 0x301   : > { %v1071_v44 = vmul.f32 0.35355338, %v1065_v36 }
 0x302   : > { %v1126_v37 = vpop.f32.mrf.mxu1 }
 0x303   : > { %v1132_v38 = vmul.f32 0.35355338, %v1126_v37  ;;  %v1074_v45 = vsel %vm1073_vm7, %v1071_v44, -inf }
 0x305   : > { %v1134_v39 = vsel %vm1073_vm7, %v1132_v38, -inf }
 0x306   : > { %1135 = vmax.xlane.f32.xlu2 %v1134_v39 }
 0x308   : > { %v1068_v42 = vpop.f32.mrf.mxu0 }
 0x309   : > { %v1072_v57 = vmul.f32 0.35355338, %v1068_v42 }
 0x30a   : > { %v1129_v40 = vpop.f32.mrf.mxu1 }
 0x30b   : > { %v1133_v41 = vmul.f32 0.35355338, %v1129_v40  ;;  %v1078_v0 = vsel %vm1077_vm8, %v1072_v57, -inf }
 0x30d   : > { %v1137_v43 = vsel %vm1077_vm8, %v1133_v41, -inf }
 0x30e   : > { %1138 = vmax.xlane.f32.xlu2 %v1137_v43 }
 0x310   : > { %v1250_v46 = vpop.f32.mrf.mxu0 }
 0x311   : > { %v1256_v47 = vmul.f32 0.35355338, %v1250_v46 }
 0x313   : > { %v1258_v48 = vsel %vm1073_vm7, %v1256_v47, -inf }
 0x316   : > { %1075 = vmax.xlane.f32.xlu2 %v1074_v45 }
 0x318   : > { %v1253_v36 = vpop.f32.mrf.mxu0 }
 0x31e   : > { %1259 = vmax.xlane.f32.xlu2 %v1258_v48 }
 0x379   : > { %v1136_v49 = vpop.xlane.xlu2 %1135 }
 0x37a   : > { %v1140_v50 = vsub.f32 %v1132_v38, %v1136_v49  ;;  %v1257_v38 = vmul.f32 0.35355338, %v1253_v36 }
 0x37c   : > { %v1142_v51 = vmul.f32 1.442695, %v1140_v50  ;;  %v1261_v40 = vsel %vm1077_vm8, %v1257_v38, -inf }
 0x37e   : > { %2946 = vpow2.f32 %v1142_v51 }
 0x381   : > { %v1139_v52 = vpop.xlane.xlu2 %1138 }
 0x382   : > { %v1141_v53 = vsub.f32 %v1133_v41, %v1139_v52 }
 0x384   : > { %v2947_v54 = vpop.eup %2946  ;;  %v1144_v55 = vmul.f32 1.442695, %v1141_v53 }
 0x385   : > { %v1146_v56 = vsel %vm1073_vm7, %v2947_v54, 0.0 }
 0x386   : > { %2948 = vpow2.f32 %v1144_v55  ;;  %1147 = vadd.xlane.f32.xlu0 %v1146_v56 }
 0x389   : > { %v1076_v58 = vpop.xlane.xlu2 %1075 }
 0x38a   : > { %v1081_v59 = vsub.f32 %v1071_v44, %v1076_v58 }
 0x38c   : > { %v2949_v60 = vpop.eup %2948  ;;  %v1083_v61 = vmul.f32 1.442695, %v1081_v59 }
 0x38d   : > { %v1149_v62 = vsel %vm1077_vm8, %v2949_v60, 0.0 }
 0x38e   : > { %2950 = vpow2.f32 %v1083_v61  ;;  %1150 = vadd.xlane.f32.xlu1 %v1149_v62  ;;  %1079 = vmax.xlane.f32.xlu0 %v1078_v0  ;;  %v1410_v62 = vld [vmem:[#allocation9 + $0x18] sm:$0xff]  ;;  %v1409_v0 = vld [vmem:[#allocation9 + $0x10] sm:$0xff] }
 0x38f   : > { %1433 = vmatpush.msrb.mxu0 %v1410_v62 }
 0x391   : > { %v1260_v1 = vpop.xlane.xlu2 %1259  ;;  %1434 = vmatpush.msrb.mxu0 %v1409_v0 }
 0x392   : > { %v1264_v2 = vsub.f32 %v1256_v47, %v1260_v1 }
 0x394   : > { %v2951_v3 = vpop.eup %2950  ;;  %v1266_v5 = vmul.f32 1.442695, %v1264_v2 }
 0x395   : > { %v1087_v6 = vsel %vm1073_vm7, %v2951_v3, 0.0 }
 0x396   : > { %2952 = vpow2.f32 %v1266_v5  ;;  %1088 = vadd.xlane.f32.xlu2 %v1087_v6 }
 0x39c   : > { %v2953_v7 = vpop.eup %2952 }
 0x39d   : > { %v1270_v8 = vsel %vm1073_vm7, %v2953_v7, 0.0 }
 0x39e   : > { %1271 = vadd.xlane.f32.xlu2 %v1270_v8 }
 0x3f9   : > { %v1148_v10 = vpop.xlane.xlu0 %1147 }
 0x3fa   : > { %2954 = vrcp.f32 %v1148_v10 }
 0x400   : > { %v2955_v11 = vpop.eup %2954 }
 0x401   : > { %v1154_v12 = vmul.f32 %v2955_v11, %v2947_v54  ;;  %v1151_v13 = vpop.xlane.xlu1 %1150  ;;  %v1080_v32 = vpop.xlane.xlu0 %1079 }
 0x402   : > { %2956 = vrcp.f32 %v1151_v13  ;;  %v1082_v34 = vsub.f32 %v1072_v57, %v1080_v32  ;;  %v1407_v13 = vld [vmem:[#allocation9] sm:$0xff] }
 0x403   : > { %2668 = vmatmul.msk.f32.vlgmr.msra.gmra.mxu2 %vm1073_vm7, %v1154_v12  ;;  %v1408_v12 = vld [vmem:[#allocation9 + $0x8] sm:$0xff] }
 0x404   : > { %v1085_v37 = vmul.f32 1.442695, %v1082_v34  ;;  %1435 = vmatpush.msrb.mxu0 %v1408_v12 }
 0x406   : > { %1436 = vmatpush.msrb.mxu0 %v1407_v13 }
 0x408   : > { %v2957_v14 = vpop.eup %2956 }
 0x409   : > { %v1089_v15 = vpop.xlane.xlu2 %1088  ;;  %v1155_v16 = vmul.f32 %v2957_v14, %v2949_v60 }
 0x40a   : > { %2958 = vrcp.f32 %v1089_v15 }
 0x40b   : > { %2669 = vmatmul.msk.f32.gmra.mxu2 %vm1073_vm7, %v1155_v16 }
 0x410   : > { %v2959_v19 = vpop.eup %2958 }
 0x411   : > { %v1095_v20 = vmul.f32 %v2959_v19, %v2951_v3  ;;  %v1272_v21 = vpop.xlane.xlu2 %1271 }
 0x412   : > { %2960 = vrcp.f32 %v1272_v21 }
 0x413   : > { %2672 = vmatmul.msk.f32.vlgmr.msra.gmra.mxu3 %vm1073_vm7, %v1095_v20  ;;  %2684 = vmatmul.msk.f32.vlgmr.msrb.gmra.mxu2 %vm850_vm2, %v1316_v22  ;;  %2962 = vpow2.f32 %v1085_v37 }
 0x418   : > { %v2961_v24 = vpop.eup %2960 }
 0x419   : > { %v1278_v26 = vmul.f32 %v2961_v24, %v2953_v7  ;;  %v2963_v42 = vpop.eup %2962 }
 0x41a   : > { %v1090_v43 = vsel %vm1077_vm8, %v2963_v42, 0.0 }
 0x41b   : > { %2680 = vmatmul.msk.f32.vlgmr.msra.gmra.mxu1 %vm1073_vm7, %v1278_v26  ;;  %2685 = vmatmul.msk.f32.gmra.mxu2 %vm850_vm2, %v1317_v28 }
 0x486   : > { %v3907_v29 = vpop.f32.mrf.mxu2 }
 0x48e   : > { %v3909_v30 = vpop.f32.mrf.mxu2 }
 0x496   : > { %v1343_v23 = vpop.f32.mrf.mxu2  ;;  %v1215_v14 = vpop.f32.mrf.mxu3 }
 0x497   : > { %v1349_v33 = vmul.f32 0.35355338, %v1343_v23  ;;  %v1216_v16 = vadd.f32 %v1215_v14, %v3907_v29 }
 0x498   : > { %v1306_v19 = vpop.f32.mrf.mxu1 }
 0x499   : > { %v1351_v35 = vsel %vm1073_vm7, %v1349_v33, -inf  ;;  %v1312_v20 = vadd.f32 %v1306_v19, %v1216_v16 }
 0x49a   : > { %1352 = vmax.xlane.f32.xlu1 %v1351_v35 }
 0x49e   : > { %v1346_v39 = vpop.f32.mrf.mxu2 }
 0x49f   : > { %v1350_v31 = vmul.f32 0.35355338, %v1346_v39 }
 0x4a1   : > { %v1354_v41 = vsel %vm1077_vm8, %v1350_v31, -inf }
 0x4a2   : > { %1262 = vmax.xlane.f32.xlu1 %v1261_v40  ;;  %1355 = vmax.xlane.f32.xlu0 %v1354_v41 }
 0x4aa   : > { %1091 = vadd.xlane.f32.xlu0 %v1090_v43 }
 0x50d   : > { %v1353_v44 = vpop.xlane.xlu1 %1352 }
 0x50e   : > { %v1357_v45 = vsub.f32 %v1349_v33, %v1353_v44  ;;  %v2922_v33 = vld [vmem:[%s4211_s8] ss:$0 sm:$0xff] }
 0x510   : > { %v1359_v46 = vmul.f32 1.442695, %v1357_v45 }
 0x512   : > { %2964 = vpow2.f32 %v1359_v46 }
 0x515   : > { %v1263_v47 = vpop.xlane.xlu1 %1262  ;;  %v1356_v48 = vpop.xlane.xlu0 %1355 }
 0x516   : > { %v1265_v49 = vsub.f32 %v1257_v38, %v1263_v47  ;;  %v1358_v50 = vsub.f32 %v1350_v31, %v1356_v48  ;;  %v1504_v48 = vld [vmem:[#allocation13 + $0x10] sm:$0xff] }
 0x518   : > { %v2965_v51 = vpop.eup %2964  ;;  %v1268_v52 = vmul.f32 1.442695, %v1265_v49  ;;  %v1361_v53 = vmul.f32 1.442695, %v1358_v50  ;;  %v1503_v49 = vld [vmem:[#allocation13 + $0x8] sm:$0xff]  ;;  %v1502_v50 = vld [vmem:[#allocation13] sm:$0xff] }
 0x519   : > { %v1363_v54 = vsel %vm1073_vm7, %v2965_v51, 0.0 }
 0x51a   : > { %2966 = vpow2.f32 %v1268_v52  ;;  %1364 = vadd.xlane.f32.xlu1 %v1363_v54 }
 0x51b   : > { %2968 = vpow2.f32 %v1361_v53 }
 0x51d   : > { %v1092_v55 = vpop.xlane.xlu0 %1091 }
 0x51e   : > { %2970 = vrcp.f32 %v1092_v55 }
 0x520   : > { %v2967_v56 = vpop.eup %2966 }
 0x521   : > { %v2969_v57 = vpop.eup %2968  ;;  %v1273_v58 = vsel %vm1077_vm8, %v2967_v56, 0.0 }
 0x522   : > { %1274 = vadd.xlane.f32.xlu1 %v1273_v58  ;;  %v1366_v59 = vsel %vm1077_vm8, %v2969_v57, 0.0 }
 0x523   : > { %1367 = vadd.xlane.f32.xlu0 %v1366_v59 }
 0x524   : > { %v2971_v60 = vpop.eup %2970 }
 0x525   : > { %v1096_v61 = vmul.f32 %v2971_v60, %v2963_v42 }
 0x527   : > { %2673 = vmatmul.msk.f32.gmra.mxu3 %vm1073_vm7, %v1096_v61 }
 0x58d   : > { %v1365_v1 = vpop.xlane.xlu1 %1364 }
 0x58e   : > { %2972 = vrcp.f32 %v1365_v1  ;;  %v2923_v1 = vld [vmem:[#allocation10] ss:$0 sm:$0xff] }
 0x594   : > { %v2973_v2 = vpop.eup %2972 }
 0x595   : > { %v1371_v3 = vmul.f32 %v2973_v2, %v2965_v51  ;;  %v1275_v5 = vpop.xlane.xlu1 %1274 }
 0x596   : > { %2974 = vrcp.f32 %v1275_v5  ;;  %v1368_v6 = vpop.xlane.xlu0 %1367 }
 0x597   : > { %2976 = vrcp.f32 %v1368_v6  ;;  %2688 = vmatmul.msk.f32.vlgmr.msrb.gmra.mxu3 %vm1073_vm7, %v1371_v3 }
 0x59c   : > { %v2975_v7 = vpop.eup %2974 }
 0x59d   : > { %v2977_v8 = vpop.eup %2976  ;;  %v1279_v10 = vmul.f32 %v2975_v7, %v2967_v56  ;;  %v2924_v7 = vld [vmem:[#allocation12] ss:$0 sm:$0xff] }
 0x59e   : > { %v1372_v11 = vmul.f32 %v2977_v8, %v2969_v57 }
 0x59f   : > { %2681 = vmatmul.msk.f32.gmra.mxu1 %vm1073_vm7, %v1279_v10 }
 0x5a0   : > { %2689 = vmatmul.msk.f32.gmra.mxu3 %vm1073_vm7, %v1372_v11 }
 0x5aa   : > { %v1218_v15 = vpop.f32.mrf.mxu3 }
 0x5ab   : > { %v1219_v26 = vadd.f32 %v1218_v15, %v3909_v30 }
 0x61a   : > { %v1399_v21 = vpop.f32.mrf.mxu3 }
 0x61b   : > { %v1405_v22 = vadd.f32 %v1399_v21, %v1312_v20  ;;  %v1564_v20 = vld [vmem:[%s4216_s13 + $0x38] sm:$0xff]  ;;  %v1563_v21 = vld [vmem:[%s4216_s13 + $0x30] sm:$0xff] }
 0x61c   : > { %v1309_v24 = vpop.f32.mrf.mxu1  ;;  %1584 = vmatpush.msra.mxu2 %v1564_v20  ;;  %v2696_v20 = vld [vmem:[%s4208_s5 + $0x60] sm:$0xff] }
 0x61d   : > { %2690 = vmatmul.msk.f32.vlgmr.msrb.gmra.mxu0 %vm850_vm2, %v1405_v22  ;;  %v1313_v28 = vadd.f32 %v1309_v24, %v1219_v26  ;;  %v1562_v22 = vld [vmem:[%s4216_s13 + $0x28] sm:$0xff]  ;;  %v1561_v24 = vld [vmem:[%s4216_s13 + $0x20] sm:$0xff]  ;;  %v1560_v26 = vld [vmem:[%s4216_s13 + $0x18] sm:$0xff] }
 0x61e   : > { %1585 = vmatpush.msra.mxu2 %v1563_v21  ;;  %v2702_v21 = vld [vmem:[%s4208_s5 + $0x80] sm:$0xff] }
 0x620   : > { %1586 = vmatpush.msra.mxu2 %v1562_v22  ;;  %v2708_v22 = vld [vmem:[%s4208_s5 + $0xa0] sm:$0xff] }
 0x622   : > { %1587 = vmatpush.msra.mxu2 %v1561_v24 }
 0x623   : > { %v1402_v32 = vpop.f32.mrf.mxu3 }
 0x624   : > { %v1406_v23 = vadd.f32 %v1402_v32, %v1313_v28  ;;  %v1559_v28 = vld [vmem:[%s4216_s13 + $0x10] sm:$0xff]  ;;  %1588 = vmatpush.msra.mxu2 %v1560_v26  ;;  %v1558_v32 = vld [vmem:[%s4216_s13 + $0x8] sm:$0xff] }
 0x626   : > { %2691 = vmatmul.msk.f32.gmra.mxu0 %vm850_vm2, %v1406_v23  ;;  %1589 = vmatpush.msra.mxu2 %v1559_v28  ;;  %v1557_v23 = vld [vmem:[%s4216_s13] sm:$0xff] }
 0x628   : > { %1590 = vmatpush.msra.mxu2 %v1558_v32 }
 0x62a   : > { %1591 = vmatpush.msra.mxu2 %v1557_v23 }
 0x69a   : > { %v1438_v34 = vpop.f32.mrf.mxu0 }
 0x69b   : > { %v1439_v29 = vadd.f32 %v2922_v33, %v1438_v34 }
 0x69d   : > { %v1444_v35 = vadd.f32 %v1439_v29, %v3797_v4 }
 0x69f   : > { %v1448_v36 = vsel %vm850_vm2, %v1444_v35, 0.0 }
 0x6a0   : > { %1449 = vadd.xlane.f32.xlu2 %v1448_v36 }
 0x6a3   : > { %v1441_v37 = vpop.f32.mrf.mxu0 }
 0x6a4   : > { %v1442_v38 = vadd.f32 %v2922_v33, %v1441_v37  ;;  %v2925_v33 = vld [vmem:[#allocation15] ss:$0 sm:$0xff] }
 0x6a6   : > { %v1445_v30 = vadd.f32 %v1442_v38, %v3792_v63  ;;  %v1505_v63 = vld [vmem:[#allocation13 + $0x18] sm:$0xff] }
 0x6a7   : > { %1528 = vmatpush.msrb.mxu1 %v1505_v63 }
 0x6a8   : > { %v1451_v39 = vsel %vm854_vm1, %v1445_v30, 0.0 }
 0x6a9   : > { %1452 = vadd.xlane.f32.xlu0 %v1451_v39  ;;  %1529 = vmatpush.msrb.mxu1 %v1504_v48 }
 0x6ab   : > { %1530 = vmatpush.msrb.mxu1 %v1503_v49 }
 0x6ad   : > { %1531 = vmatpush.msrb.mxu1 %v1502_v50 }
 0x713   : > { %v1450_v31 = vpop.xlane.xlu2 %1449 }
 0x714   : > { %v1454_v40 = vmul.f32 %v1450_v31, %v3744_v18 }
 0x716   : > { %v1456_v41 = vsub.f32 %v1444_v35, %v1454_v40 }
 0x718   : > { %v1458_v42 = vmul.f32 %v1456_v41, %v1456_v41 }
 0x71a   : > { %v1460_v43 = vsel %vm850_vm2, %v1458_v42, 0.0 }
 0x71b   : > { %1461 = vadd.xlane.f32.xlu1 %v1460_v43 }
 0x71c   : > { %v1453_v44 = vpop.xlane.xlu0 %1452 }
 0x71d   : > { %v1455_v4 = vmul.f32 %v1453_v44, %v3744_v18 }
 0x71f   : > { %v1457_v45 = vsub.f32 %v1445_v30, %v1455_v4 }
 0x721   : > { %v1459_v46 = vmul.f32 %v1457_v45, %v1457_v45 }
 0x723   : > { %v1463_v47 = vsel %vm854_vm1, %v1459_v46, 0.0 }
 0x724   : > { %1464 = vadd.xlane.f32.xlu2 %v1463_v47 }
 0x78e   : > { %v1462_v51 = vpop.xlane.xlu1 %1461 }
 0x78f   : > { %v1466_v52 = vmul.f32 %v1462_v51, %v3744_v18  ;;  %v2926_v51 = vld [vmem:[#allocation16] ss:$0 sm:$0xff] }
 0x791   : > { %v1468_v53 = vadd.f32 1e-12, %v1466_v52 }
 0x793   : > { %2978 = vrsqrt.f32 %v1468_v53  ;;  %vm1476_vm10 = vweird.f32 %v1468_v53 }
 0x797   : > { %v1465_v54 = vpop.xlane.xlu2 %1464 }
 0x798   : > { %v1467_v55 = vmul.f32 %v1465_v54, %v3744_v18 }
 0x799   : > { %v2979_v56 = vpop.eup %2978 }
 0x79a   : > { %v1471_v57 = vmul.f32 %v2979_v56, %v1468_v53  ;;  %v1469_v58 = vadd.f32 1e-12, %v1467_v55  ;;  %vm1477_vm9 = vweird.f32 %v2979_v56 }
 0x79b   : > { %vm1478_vm11 = vmor %vm1476_vm10, %vm1477_vm9 }
 0x79c   : > { %v1472_v59 = vmul.f32 %v2979_v56, %v1471_v57  ;;  %2980 = vrsqrt.f32 %v1469_v58  ;;  %vm1486_vm0 = vweird.f32 %v1469_v58 }
 0x79e   : > { %v1473_v60 = vmul.f32 0.5, %v1472_v59 }
 0x7a0   : > { %v1474_v61 = vsub.f32 1.5, %v1473_v60 }
 0x7a2   : > { %v2981_v62 = vpop.eup %2980  ;;  %v1475_v0 = vmul.f32 %v2979_v56, %v1474_v61 }
 0x7a3   : > { %v1481_v2 = vmul.f32 %v2981_v62, %v1469_v58  ;;  %vm1487_vm15 = vweird.f32 %v2981_v62 }
 0x7a4   : > { %v1479_v3 = vsel %vm1478_vm11, %v2979_v56, %v1475_v0  ;;  %vm1488_vm3 = vmor %vm1486_vm0, %vm1487_vm15 }
 0x7a5   : > { %v1490_v5 = vmul.f32 %v1479_v3, %v1456_v41  ;;  %v1482_v6 = vmul.f32 %v2981_v62, %v1481_v2 }
 0x7a7   : > { %v1495_v8 = vmul.f32 %v2923_v1, %v1490_v5  ;;  %v1483_v10 = vmul.f32 0.5, %v1482_v6 }
 0x7a9   : > { %v1484_v11 = vsub.f32 1.5, %v1483_v10  ;;  %v1500_v12 = vadd.f32 %v2924_v7, %v1495_v8  ;;  %v2699_v8 = vld [vmem:[%s4208_s5 + $0x78] sm:$0xff] }
 0x7aa   : > { %v2705_v10 = vld [vmem:[%s4208_s5 + $0x98] sm:$0xff]  ;;  %1685 = vmatpush.msra.mxu3 %v2699_v8 }
 0x7ab   : > { %v1485_v13 = vmul.f32 %v2981_v62, %v1484_v11  ;;  %2692 = vmatmul.msk.f32.vlgmr.msrb.gmra.mxu1 %vm850_vm2, %v1500_v12  ;;  %v2711_v11 = vld [vmem:[%s4208_s5 + $0xb8] sm:$0xff]  ;;  %1718 = vmatpush.msra.mxu0 %v2705_v10 }
 0x7ac   : > { %1751 = vmatpush.msra.mxu1 %v2711_v11 }
 0x7ad   : > { %v1489_v14 = vsel %vm1488_vm3, %v2981_v62, %v1485_v13  ;;  %v2704_v13 = vld [vmem:[%s4208_s5 + $0x90] sm:$0xff] }
 0x7ae   : > { %v1491_v15 = vmul.f32 %v1489_v14, %v1457_v45  ;;  %v2710_v14 = vld [vmem:[%s4208_s5 + $0xb0] sm:$0xff]  ;;  %1719 = vmatpush.msra.mxu0 %v2704_v13 }
 0x7af   : > { %1752 = vmatpush.msra.mxu1 %v2710_v14 }
 0x7b0   : > { %v1496_v16 = vmul.f32 %v2923_v1, %v1491_v15  ;;  %v2697_v15 = vld [vmem:[%s4208_s5 + $0x68] sm:$0xff] }
 0x7b2   : > { %v1501_v19 = vadd.f32 %v2924_v7, %v1496_v16  ;;  %v2703_v16 = vld [vmem:[%s4208_s5 + $0x88] sm:$0xff] }
 0x7b3   : > { %1720 = vmatpush.msra.mxu0 %v2703_v16 }
 0x7b4   : > { %2693 = vmatmul.msk.f32.gmra.mxu1 %vm850_vm2, %v1501_v19 }
 0x7b5   : > { %1721 = vmatpush.msra.mxu0 %v2702_v21 }
 0x828   : > { %v1533_v34 = vpop.f32.mrf.mxu1 }
 0x829   : > { %v1534_v29 = vadd.f32 %v2925_v33, %v1533_v34 }
 0x82b   : > { %v1541_v35 = vmul.f32 0.044715, %v1534_v29  ;;  %v1539_v4 = vmul.f32 0.5, %v1534_v29 }
 0x82d   : > { %v1543_v36 = vmul.f32 %v1541_v35, %v1534_v29 }
 0x82f   : > { %v1545_v37 = vmul.f32 %v1543_v36, %v1534_v29 }
 0x831   : > { %v1547_v38 = vadd.f32 %v1545_v37, %v1534_v29  ;;  %v1536_v30 = vpop.f32.mrf.mxu1 }
 0x832   : > { %v1537_v39 = vadd.f32 %v2925_v33, %v1536_v30 }
 0x833   : > { %v1549_v31 = vmul.f32 0.7978846, %v1547_v38 }
 0x834   : > { %v1542_v40 = vmul.f32 0.044715, %v1537_v39  ;;  %v1540_v48 = vmul.f32 0.5, %v1537_v39 }
 0x835   : > { %2982 = vtanh.f32 %v1549_v31 }
 0x836   : > { %v1544_v41 = vmul.f32 %v1542_v40, %v1537_v39 }
 0x838   : > { %v1546_v42 = vmul.f32 %v1544_v41, %v1537_v39 }
 0x83a   : > { %v1548_v43 = vadd.f32 %v1546_v42, %v1537_v39  ;;  %v2927_v39 = vld [vmem:[#allocation18] ss:$0 sm:$0xff] }
 0x83b   : > { %v2983_v44 = vpop.eup %2982 }
 0x83c   : > { %v1553_v45 = vadd.f32 1.0, %v2983_v44  ;;  %v1550_v46 = vmul.f32 0.7978846, %v1548_v43  ;;  %v2928_v43 = vld [vmem:[#allocation19] ss:$0 sm:$0xff] }
 0x83e   : > { %v1555_v47 = vmul.f32 %v1553_v45, %v1539_v4  ;;  %2984 = vtanh.f32 %v1550_v46 }
 0x840   : > { %2694 = vmatmul.msk.f32.vlgmr.msra.gmra.mxu2 %vm1569_vm4, %v1555_v47 }
 0x844   : > { %v2985_v63 = vpop.eup %2984 }
 0x845   : > { %v1554_v49 = vadd.f32 1.0, %v2985_v63 }
 0x847   : > { %v1556_v50 = vmul.f32 %v1554_v49, %v1540_v48 }
 0x849   : > { %2695 = vmatmul.msk.f32.gmra.mxu2 %vm1569_vm4, %v1556_v50 }
 0x8c3   : > { %v1593_v52 = vpop.f32.mrf.mxu2 }
 0x8c4   : > { %v1594_v53 = vadd.f32 %v2926_v51, %v1593_v52 }
 0x8c6   : > { %v1599_v54 = vadd.f32 %v1594_v53, %v1500_v12  ;;  %v2698_v12 = vld [vmem:[%s4208_s5 + $0x70] sm:$0xff]  ;;  %v2929_v53 = vld [vmem:[#allocation7 + $0x4] ss:$0 sm:$0xff] }
 0x8c7   : > { %1686 = vmatpush.msra.mxu3 %v2698_v12 }
 0x8c8   : > { %v1603_v55 = vsel %vm850_vm2, %v1599_v54, 0.0 }
 0x8c9   : > { %1604 = vadd.xlane.f32.xlu0 %v1603_v55  ;;  %1687 = vmatpush.msra.mxu3 %v2697_v15 }
 0x8cb   : > { %1688 = vmatpush.msra.mxu3 %v2696_v20 }
 0x8cc   : > { %v1596_v56 = vpop.f32.mrf.mxu2 }
 0x8cd   : > { %v1597_v57 = vadd.f32 %v2926_v51, %v1596_v56 }
 0x8cf   : > { %v1600_v58 = vadd.f32 %v1597_v57, %v1501_v19  ;;  %v2709_v19 = vld [vmem:[%s4208_s5 + $0xa8] sm:$0xff] }
 0x8d0   : > { %1753 = vmatpush.msra.mxu1 %v2709_v19 }
 0x8d1   : > { %v1606_v59 = vsel %vm854_vm1, %v1600_v58, 0.0 }
 0x8d2   : > { %1607 = vadd.xlane.f32.xlu1 %v1606_v59  ;;  %1754 = vmatpush.msra.mxu1 %v2708_v22  ;;  %v2931_v59 = vld [vmem:[#allocation7 + $0x3] ss:$0 sm:$0xff] }
 0x93c   : > { %v1605_v60 = vpop.xlane.xlu0 %1604 }
 0x93d   : > { %v1609_v61 = vmul.f32 %v1605_v60, %v3744_v18 }
 0x93f   : > { %v1611_v62 = vsub.f32 %v1599_v54, %v1609_v61  ;;  %v2930_v54 = vld [vmem:[#allocation7 + $0x5] ss:$0 sm:$0xff] }
 0x941   : > { %v1613_v0 = vmul.f32 %v1611_v62, %v1611_v62 }
 0x943   : > { %v1615_v1 = vsel %vm850_vm2, %v1613_v0, 0.0 }
 0x944   : > { %1616 = vadd.xlane.f32.xlu2 %v1615_v1 }
 0x945   : > { %v1608_v2 = vpop.xlane.xlu1 %1607 }
 0x946   : > { %v1610_v3 = vmul.f32 %v1608_v2, %v3744_v18 }
 0x948   : > { %v3972_v5 = vsub.f32 %v1600_v58, %v1610_v3 }
 0x94a   : > { %v1614_v6 = vmul.f32 %v3972_v5, %v3972_v5 }
 0x94c   : > { %v1618_v7 = vsel %vm854_vm1, %v1614_v6, 0.0 }
 0x94d   : > { %1619 = vadd.xlane.f32.xlu0 %v1618_v7 }
 0x9b7   : > { %v1617_v24 = vpop.xlane.xlu2 %1616 }
 0x9b8   : > { %v1621_v26 = vmul.f32 %v1617_v24, %v3744_v18 }
 0x9ba   : > { %v1623_v28 = vadd.f32 1e-12, %v1621_v26 }
 0x9bc   : > { %2986 = vrsqrt.f32 %v1623_v28  ;;  %vm1631_vm10 = vweird.f32 %v1623_v28 }
 0x9c0   : > { %v1620_v32 = vpop.xlane.xlu0 %1619 }
 0x9c1   : > { %v1622_v23 = vmul.f32 %v1620_v32, %v3744_v18 }
 0x9c2   : > { %v2987_v33 = vpop.eup %2986 }
 0x9c3   : > { %v1626_v34 = vmul.f32 %v2987_v33, %v1623_v28  ;;  %v1624_v29 = vadd.f32 1e-12, %v1622_v23  ;;  %vm1632_vm9 = vweird.f32 %v2987_v33 }
 0x9c4   : > { %vm1633_vm11 = vmor %vm1631_vm10, %vm1632_vm9 }
 0x9c5   : > { %v1627_v35 = vmul.f32 %v2987_v33, %v1626_v34  ;;  %2988 = vrsqrt.f32 %v1624_v29  ;;  %vm1641_vm0 = vweird.f32 %v1624_v29 }
 0x9c7   : > { %v1628_v36 = vmul.f32 0.5, %v1627_v35 }
 0x9c9   : > { %v1629_v37 = vsub.f32 1.5, %v1628_v36 }
 0x9cb   : > { %v2989_v38 = vpop.eup %2988  ;;  %v1630_v30 = vmul.f32 %v2987_v33, %v1629_v37 }
 0x9cc   : > { %v1636_v31 = vmul.f32 %v2989_v38, %v1624_v29  ;;  %vm1642_vm15 = vweird.f32 %v2989_v38 }
 0x9cd   : > { %v1634_v40 = vsel %vm1633_vm11, %v2987_v33, %v1630_v30  ;;  %vm1643_vm3 = vmor %vm1641_vm0, %vm1642_vm15 }
 0x9ce   : > { %v1645_v41 = vmul.f32 %v1634_v40, %v1611_v62  ;;  %v1637_v42 = vmul.f32 %v2989_v38, %v1636_v31 }
 0x9d0   : > { %v1650_v44 = vmul.f32 %v2927_v39, %v1645_v41  ;;  %v1638_v4 = vmul.f32 0.5, %v1637_v42 }
 0x9d2   : > { %v1639_v45 = vsub.f32 1.5, %v1638_v4  ;;  %v4015_v46 = vadd.f32 %v2928_v43, %v1650_v44 }
 0x9d4   : > { %v1640_v47 = vmul.f32 %v2989_v38, %v1639_v45  ;;  %2700 = vmatmul.msk.f32.vlgmr.msra.gmra.mxu3 %vm850_vm2, %v4015_v46  ;;  %2706 = vmatmul.msk.f32.vlgmr.msra.gmra.mxu0 %vm850_vm2, %v4015_v46 }
 0x9d5   : > { %2712 = vmatmul.msk.f32.vlgmr.msra.gmra.mxu1 %vm850_vm2, %v4015_v46 }
 0x9d6   : > { %v1644_v63 = vsel %vm1643_vm3, %v2989_v38, %v1640_v47 }
 0x9d7   : > { %v1646_v48 = vmul.f32 %v1644_v63, %v3972_v5 }
 0x9d9   : > { %v1651_v49 = vmul.f32 %v2927_v39, %v1646_v48 }
 0x9db   : > { %v4024_v50 = vadd.f32 %v2928_v43, %v1651_v49 }
 0x9dd   : > { %2701 = vmatmul.msk.f32.gmra.mxu3 %vm850_vm2, %v4024_v50  ;;  %2707 = vmatmul.msk.f32.gmra.mxu0 %vm850_vm2, %v4024_v50 }
 0x9de   : > { %2713 = vmatmul.msk.f32.gmra.mxu1 %vm850_vm2, %v4024_v50 }
 0xa51   : > { %v1723_v51 = vpop.f32.mrf.mxu0 }
 0xa52   : > { %v1756_v52 = vpop.f32.mrf.mxu1  ;;  %v1724_v1 = vadd.f32 %v2929_v53, %v1723_v51 }
 0xa53   : > { %v1757_v0 = vadd.f32 %v2930_v54, %v1756_v52 }
 0xa57   : > { %v1690_v56 = vpop.f32.mrf.mxu3 }
 0xa58   : > { %v4040_v2 = vadd.f32 %v2931_v59, %v1690_v56 }
 0xa5a   : > { %v1726_v55 = vpop.f32.mrf.mxu0  ;;  %v1762_v6 = vsel %vm916_vm14, %v4040_v2, 0.0  ;;  %v1825_v8 = vsel %vm3815_vm13, %v4040_v2, 0.0  ;;  %v1946_v13 = vsel %vm3844_vm6, %v4040_v2, 0.0 }
 0xa5b   : > { %v1727_v57 = vadd.f32 %v2929_v53, %v1726_v55  ;;  %v1759_v58 = vpop.f32.mrf.mxu1 }
 0xa5c   : > { %v1760_v60 = vadd.f32 %v2930_v54, %v1759_v58 }
 0xa5d   : > { %2714 = vmatpush.xpose.msk.msrb.mxu2 %vm850_vm2, %v1727_v57  ;;  %2718 = vmatpush.xpose.msk.msrb.mxu3 %vm850_vm2, %v1727_v57 }
 0xa5e   : > { %v1828_v61 = vsel %vm3815_vm13, %v1760_v60, 0.0  ;;  %v1765_v62 = vsel %vm916_vm14, %v1760_v60, 0.0  ;;  %v2040_v3 = vsel %vm3836_vm5, %v1760_v60, 0.0  ;;  %v1949_v5 = vsel %vm3844_vm6, %v1760_v60, 0.0 }
 0xa5f   : > { %2722 = vmatpush.msk.msrb.mxu0 %vm1162_vm12, %v1828_v61  ;;  %2726 = vmatpush.msk.msrb.mxu1 %vm1162_vm12, %v1765_v62 }
 0xa60   : > { %v1693_v7 = vpop.f32.mrf.mxu3 }
 0xa61   : > { %2723 = vmatpush.msk.msrb.mxu0 %vm3815_vm13, %v1757_v0  ;;  %2727 = vmatpush.msk.msrb.mxu1 %vm916_vm14, %v1757_v0  ;;  %v4069_v10 = vadd.f32 %v2931_v59, %v1693_v7 }
 0xa62   : > { %2715 = vmatpush.xpose.msk.msrb.mxu2 %vm850_vm2, %v1724_v1  ;;  %2719 = vmatpush.xpose.msk.msrb.mxu3 %vm850_vm2, %v1724_v1 }
 0xa63   : > { %2738 = vmatpush.xpose.msk.msra.mxu0 %vm850_vm2, %v1727_v57  ;;  %2742 = vmatpush.msk.msra.mxu1 %vm1162_vm12, %v2040_v3  ;;  %v1763_v11 = vsel %vm916_vm14, %v4069_v10, 0.0  ;;  %v1826_v12 = vsel %vm3815_vm13, %v4069_v10, 0.0  ;;  %v1947_v14 = vsel %vm3844_vm6, %v4069_v10, 0.0 }
 0xa65   : > { %2743 = vmatpush.msk.msra.mxu1 %vm3836_vm5, %v1757_v0  ;;  %2716 = vmatmul.msk.f32.vlgmr.msrb.gmra.mxu2 %vm850_vm2, %v1762_v6 }
 0xa66   : > { %2730 = vmatpush.xpose.msk.msra.mxu2 %vm850_vm2, %v1727_v57  ;;  %2734 = vmatpush.msk.msra.mxu3 %vm1162_vm12, %v1949_v5 }
 0xa67   : > { %2720 = vmatmul.msk.f32.vlgmr.msrb.gmra.mxu3 %vm850_vm2, %v1825_v8  ;;  %2739 = vmatpush.xpose.msk.msra.mxu0 %vm850_vm2, %v1724_v1 }
 0xa68   : > { %2735 = vmatpush.msk.msra.mxu3 %vm3844_vm6, %v1757_v0  ;;  %v2037_v0 = vsel %vm3836_vm5, %v4040_v2, 0.0 }
 0xa6a   : > { %2731 = vmatpush.xpose.msk.msra.mxu2 %vm850_vm2, %v1724_v1  ;;  %v2038_v1 = vsel %vm3836_vm5, %v4069_v10, 0.0 }
 0xa6d   : > { %2717 = vmatmul.msk.f32.gmra.mxu2 %vm850_vm2, %v1763_v11 }
 0xa6f   : > { %2721 = vmatmul.msk.f32.gmra.mxu3 %vm850_vm2, %v1826_v12 }
 0xa75   : > { %2732 = vmatmul.msk.f32.vlgmr.msra.gmra.mxu2 %vm850_vm2, %v1946_v13 }
 0xa7d   : > { %2733 = vmatmul.msk.f32.gmra.mxu2 %vm850_vm2, %v1947_v14 }
 0xae8   : > { %v1795_v9 = vpop.f32.mrf.mxu2 }
 0xae9   : > { %v1801_v24 = vmul.f32 0.35355338, %v1795_v9 }
 0xaea   : > { %v1852_v15 = vpop.f32.mrf.mxu3 }
 0xaeb   : > { %v1858_v16 = vmul.f32 0.35355338, %v1852_v15  ;;  %v1803_v28 = vsel %vm1073_vm7, %v1801_v24, -inf }
 0xaed   : > { %v1860_v17 = vsel %vm1073_vm7, %v1858_v16, -inf }
 0xaee   : > { %1861 = vmax.xlane.f32.xlu1 %v1860_v17 }
 0xaf0   : > { %v1798_v19 = vpop.f32.mrf.mxu2 }
 0xaf1   : > { %v1802_v39 = vmul.f32 0.35355338, %v1798_v19 }
 0xaf2   : > { %v1855_v20 = vpop.f32.mrf.mxu3 }
 0xaf3   : > { %v1859_v21 = vmul.f32 0.35355338, %v1855_v20  ;;  %v1806_v44 = vsel %vm1077_vm8, %v1802_v39, -inf }
 0xaf5   : > { %v1863_v22 = vsel %vm1077_vm8, %v1859_v21, -inf }
 0xaf6   : > { %1864 = vmax.xlane.f32.xlu2 %v1863_v22 }
 0xaf8   : > { %v1973_v26 = vpop.f32.mrf.mxu2 }
 0xaf9   : > { %v1979_v4 = vmul.f32 0.35355338, %v1973_v26 }
 0xafb   : > { %v1981_v49 = vsel %vm1073_vm7, %v1979_v4, -inf }
 0xafe   : > { %1804 = vmax.xlane.f32.xlu2 %v1803_v28 }
 0xb00   : > { %v1976_v27 = vpop.f32.mrf.mxu2 }
 0xb01   : > { %v1980_v32 = vmul.f32 0.35355338, %v1976_v27 }
 0xb03   : > { %v1984_v23 = vsel %vm1077_vm8, %v1980_v32, -inf }
 0xb06   : > { %1985 = vmax.xlane.f32.xlu2 %v1984_v23 }
 0xb61   : > { %v1862_v33 = vpop.xlane.xlu1 %1861 }
 0xb62   : > { %v1866_v34 = vsub.f32 %v1858_v16, %v1862_v33 }
 0xb64   : > { %v1868_v29 = vmul.f32 1.442695, %v1866_v34 }
 0xb66   : > { %2990 = vpow2.f32 %v1868_v29 }
 0xb69   : > { %v1865_v35 = vpop.xlane.xlu2 %1864 }
 0xb6a   : > { %v1867_v36 = vsub.f32 %v1859_v21, %v1865_v35 }
 0xb6c   : > { %v2991_v37 = vpop.eup %2990  ;;  %v1870_v38 = vmul.f32 1.442695, %v1867_v36 }
 0xb6d   : > { %v1872_v30 = vsel %vm1073_vm7, %v2991_v37, 0.0 }
 0xb6e   : > { %2992 = vpow2.f32 %v1870_v38  ;;  %1873 = vadd.xlane.f32.xlu0 %v1872_v30 }
 0xb71   : > { %v1805_v31 = vpop.xlane.xlu2 %1804 }
 0xb72   : > { %v1809_v40 = vsub.f32 %v1801_v24, %v1805_v31 }
 0xb74   : > { %v2993_v41 = vpop.eup %2992  ;;  %v1811_v42 = vmul.f32 1.442695, %v1809_v40 }
 0xb75   : > { %v1875_v43 = vsel %vm1077_vm8, %v2993_v41, 0.0 }
 0xb76   : > { %2994 = vpow2.f32 %v1811_v42  ;;  %1876 = vadd.xlane.f32.xlu1 %v1875_v43  ;;  %1807 = vmax.xlane.f32.xlu0 %v1806_v44  ;;  %v2132_v42 = vld [vmem:[#allocation9 + $0x38] sm:$0xff]  ;;  %v2131_v43 = vld [vmem:[#allocation9 + $0x30] sm:$0xff] }
 0xb77   : > { %2156 = vmatpush.msrb.mxu2 %v2132_v42 }
 0xb79   : > { %v1986_v45 = vpop.xlane.xlu2 %1985  ;;  %2157 = vmatpush.msrb.mxu2 %v2131_v43 }
 0xb7a   : > { %v1988_v47 = vsub.f32 %v1980_v32, %v1986_v45 }
 0xb7c   : > { %v2995_v63 = vpop.eup %2994  ;;  %v1991_v48 = vmul.f32 1.442695, %v1988_v47 }
 0xb7d   : > { %v1815_v51 = vsel %vm1073_vm7, %v2995_v63, 0.0 }
 0xb7e   : > { %2996 = vpow2.f32 %v1991_v48  ;;  %1982 = vmax.xlane.f32.xlu1 %v1981_v49  ;;  %1816 = vadd.xlane.f32.xlu2 %v1815_v51  ;;  %v2130_v48 = vld [vmem:[#allocation9 + $0x28] sm:$0xff]  ;;  %v2129_v49 = vld [vmem:[#allocation9 + $0x20] sm:$0xff] }
 0xb7f   : > { %2158 = vmatpush.msrb.mxu2 %v2130_v48 }
 0xb81   : > { %2159 = vmatpush.msrb.mxu2 %v2129_v49 }
 0xb84   : > { %v4097_v52 = vpop.eup %2996 }
 0xb85   : > { %v1996_v53 = vsel %vm1077_vm8, %v4097_v52, 0.0 }
 0xb86   : > { %1997 = vadd.xlane.f32.xlu2 %v1996_v53 }
 0xbe1   : > { %v1874_v54 = vpop.xlane.xlu0 %1873 }
 0xbe2   : > { %2998 = vrcp.f32 %v1874_v54 }
 0xbe8   : > { %v2999_v55 = vpop.eup %2998 }
 0xbe9   : > { %v1880_v56 = vmul.f32 %v2999_v55, %v2991_v37  ;;  %v1877_v57 = vpop.xlane.xlu1 %1876  ;;  %v1808_v5 = vpop.xlane.xlu0 %1807 }
 0xbea   : > { %3000 = vrcp.f32 %v1877_v57  ;;  %v1810_v7 = vsub.f32 %v1802_v39, %v1808_v5 }
 0xbeb   : > { %2724 = vmatmul.msk.f32.vlgmr.msrb.gmra.mxu0 %vm1073_vm7, %v1880_v56 }
 0xbec   : > { %v1813_v8 = vmul.f32 1.442695, %v1810_v7 }
 0xbf0   : > { %v3001_v58 = vpop.eup %3000 }
 0xbf1   : > { %v1817_v59 = vpop.xlane.xlu2 %1816  ;;  %v1881_v60 = vmul.f32 %v3001_v58, %v2993_v41  ;;  %v1983_v11 = vpop.xlane.xlu1 %1982 }
 0xbf2   : > { %3002 = vrcp.f32 %v1817_v59  ;;  %v1987_v13 = vsub.f32 %v1979_v4, %v1983_v11 }
 0xbf3   : > { %2725 = vmatmul.msk.f32.gmra.mxu0 %vm1073_vm7, %v1881_v60  ;;  %3004 = vpow2.f32 %v1813_v8 }
 0xbf4   : > { %v1989_v9 = vmul.f32 1.442695, %v1987_v13 }
 0xbf6   : > { %3006 = vpow2.f32 %v1989_v9 }
 0xbf8   : > { %v3003_v61 = vpop.eup %3002 }
 0xbf9   : > { %v1823_v62 = vmul.f32 %v3003_v61, %v2995_v63  ;;  %v3005_v25 = vpop.eup %3004  ;;  %v1998_v37 = vpop.xlane.xlu2 %1997 }
 0xbfa   : > { %v1818_v17 = vsel %vm1077_vm8, %v3005_v25, 0.0 }
 0xbfb   : > { %2728 = vmatmul.msk.f32.vlgmr.msrb.gmra.mxu1 %vm1073_vm7, %v1823_v62  ;;  %2740 = vmatmul.msk.f32.vlgmr.msra.gmra.mxu0 %vm850_vm2, %v2037_v0  ;;  %v2932_v0 = vld [vmem:[%s4211_s8 + $0x1] ss:$0 sm:$0xff] }
 0xbfc   : > { %v3007_v19 = vpop.eup %3006 }
 0xbfd   : > { %v1993_v20 = vsel %vm1073_vm7, %v3007_v19, 0.0 }
 0xc03   : > { %2741 = vmatmul.msk.f32.gmra.mxu0 %vm850_vm2, %v2038_v1 }
 0xc68   : > { %v4112_v3 = vpop.f32.mrf.mxu0 }
 0xc70   : > { %v4114_v6 = vpop.f32.mrf.mxu0 }
 0xc78   : > { %v2064_v12 = vpop.f32.mrf.mxu0  ;;  %v1940_v51 = vpop.f32.mrf.mxu1 }
 0xc79   : > { %v2070_v2 = vmul.f32 0.35355338, %v2064_v12  ;;  %v1941_v54 = vadd.f32 %v1940_v51, %v4112_v3  ;;  %v2758_v51 = vld [vmem:[%s4216_s13 + $0x78] sm:$0xff] }
 0xc7a   : > { %2312 = vmatpush.msrb.mxu0 %v2758_v51 }
 0xc7b   : > { %v2072_v14 = vsel %vm1073_vm7, %v2070_v2, -inf }
 0xc7c   : > { %2073 = vmax.xlane.f32.xlu0 %v2072_v14 }
 0xc80   : > { %v2067_v10 = vpop.f32.mrf.mxu0 }
 0xc81   : > { %v2071_v15 = vmul.f32 0.35355338, %v2067_v10 }
 0xc83   : > { %v2075_v16 = vsel %vm1077_vm8, %v2071_v15, -inf }
 0xc84   : > { %2076 = vmax.xlane.f32.xlu1 %v2075_v16  ;;  %1819 = vadd.xlane.f32.xlu0 %v1818_v17 }
 0xc8c   : > { %1994 = vadd.xlane.f32.xlu1 %v1993_v20  ;;  %v2229_v20 = vld [vmem:[#allocation13 + $0x28] sm:$0xff] }
 0xcef   : > { %v2074_v21 = vpop.xlane.xlu0 %2073 }
 0xcf0   : > { %v2078_v22 = vsub.f32 %v2070_v2, %v2074_v21  ;;  %v2228_v21 = vld [vmem:[#allocation13 + $0x20] sm:$0xff] }
 0xcf2   : > { %v2080_v24 = vmul.f32 1.442695, %v2078_v22 }
 0xcf4   : > { %3008 = vpow2.f32 %v2080_v24 }
 0xcf7   : > { %v2077_v26 = vpop.xlane.xlu1 %2076  ;;  %v1820_v28 = vpop.xlane.xlu0 %1819 }
 0xcf8   : > { %v2079_v27 = vsub.f32 %v2071_v15, %v2077_v26  ;;  %3010 = vrcp.f32 %v1820_v28 }
 0xcfa   : > { %v3009_v32 = vpop.eup %3008  ;;  %v2082_v23 = vmul.f32 1.442695, %v2079_v27 }
 0xcfb   : > { %v2084_v33 = vsel %vm1073_vm7, %v3009_v32, 0.0 }
 0xcfc   : > { %3012 = vpow2.f32 %v2082_v23  ;;  %2085 = vadd.xlane.f32.xlu0 %v2084_v33 }
 0xcfe   : > { %v3011_v34 = vpop.eup %3010 }
 0xcff   : > { %v1995_v29 = vpop.xlane.xlu1 %1994  ;;  %v1824_v35 = vmul.f32 %v3011_v34, %v3005_v25 }
 0xd00   : > { %3014 = vrcp.f32 %v1995_v29 }
 0xd01   : > { %2729 = vmatmul.msk.f32.gmra.mxu1 %vm1073_vm7, %v1824_v35  ;;  %3016 = vrcp.f32 %v1998_v37 }
 0xd02   : > { %v3013_v36 = vpop.eup %3012 }
 0xd03   : > { %v2087_v38 = vsel %vm1077_vm8, %v3013_v36, 0.0 }
 0xd04   : > { %2088 = vadd.xlane.f32.xlu1 %v2087_v38 }
 0xd06   : > { %v3015_v30 = vpop.eup %3014 }
 0xd07   : > { %v2001_v39 = vmul.f32 %v3015_v30, %v3007_v19  ;;  %v3017_v31 = vpop.eup %3016  ;;  %v2230_v19 = vld [vmem:[#allocation13 + $0x30] sm:$0xff]  ;;  %v2933_v30 = vld [vmem:[#allocation10 + $0x1] ss:$0 sm:$0xff] }
 0xd08   : > { %v2002_v40 = vmul.f32 %v3017_v31, %v4097_v52 }
 0xd09   : > { %2736 = vmatmul.msk.f32.vlgmr.msra.gmra.mxu3 %vm1073_vm7, %v2001_v39 }
 0xd11   : > { %2737 = vmatmul.msk.f32.gmra.mxu3 %vm1073_vm7, %v2002_v40 }
 0xd6f   : > { %v2086_v41 = vpop.xlane.xlu0 %2085 }
 0xd70   : > { %3018 = vrcp.f32 %v2086_v41  ;;  %v2934_v41 = vld [vmem:[#allocation12 + $0x1] ss:$0 sm:$0xff] }
 0xd76   : > { %v3019_v44 = vpop.eup %3018 }
 0xd77   : > { %v2092_v4 = vmul.f32 %v3019_v44, %v3009_v32  ;;  %v2089_v45 = vpop.xlane.xlu1 %2088 }
 0xd78   : > { %3020 = vrcp.f32 %v2089_v45 }
 0xd79   : > { %2744 = vmatmul.msk.f32.vlgmr.msra.gmra.mxu1 %vm1073_vm7, %v2092_v4 }
 0xd7e   : > { %v3021_v47 = vpop.eup %3020  ;;  %v1943_v52 = vpop.f32.mrf.mxu1 }
 0xd7f   : > { %v2093_v63 = vmul.f32 %v3021_v47, %v3013_v36  ;;  %v1944_v59 = vadd.f32 %v1943_v52, %v4114_v6  ;;  %v2757_v52 = vld [vmem:[%s4216_s13 + $0x70] sm:$0xff] }
 0xd80   : > { %2313 = vmatpush.msrb.mxu0 %v2757_v52 }
 0xd81   : > { %2745 = vmatmul.msk.f32.gmra.mxu1 %vm1073_vm7, %v2093_v63 }
 0xd8c   : > { %v2029_v53 = vpop.f32.mrf.mxu3 }
 0xd8d   : > { %v2035_v55 = vadd.f32 %v2029_v53, %v1941_v54  ;;  %v2756_v53 = vld [vmem:[%s4216_s13 + $0x68] sm:$0xff]  ;;  %v2755_v54 = vld [vmem:[%s4216_s13 + $0x60] sm:$0xff] }
 0xd8e   : > { %2314 = vmatpush.msrb.mxu0 %v2756_v53 }
 0xd90   : > { %2315 = vmatpush.msrb.mxu0 %v2755_v54 }
 0xd94   : > { %v2032_v58 = vpop.f32.mrf.mxu3 }
 0xd95   : > { %v2036_v60 = vadd.f32 %v2032_v58, %v1944_v59  ;;  %v2751_v58 = vld [vmem:[%s4216_s13 + $0x40] sm:$0xff]  ;;  %v2935_v59 = vld [vmem:[#allocation15 + $0x1] ss:$0 sm:$0xff] }
 0xdf6   : > { %v2120_v56 = vpop.f32.mrf.mxu1 }
 0xdf7   : > { %v2126_v57 = vadd.f32 %v2120_v56, %v2035_v55  ;;  %v2754_v55 = vld [vmem:[%s4216_s13 + $0x58] sm:$0xff]  ;;  %v2753_v56 = vld [vmem:[%s4216_s13 + $0x50] sm:$0xff] }
 0xdf8   : > { %2316 = vmatpush.msrb.mxu0 %v2754_v55 }
 0xdf9   : > { %2747 = vmatmul.msk.f32.vlgmr.msrb.gmra.mxu2 %vm850_vm2, %v2126_v57  ;;  %v2752_v57 = vld [vmem:[%s4216_s13 + $0x48] sm:$0xff] }
 0xdfa   : > { %2317 = vmatpush.msrb.mxu0 %v2753_v56  ;;  %v2937_v56 = vld [vmem:[#allocation18 + $0x1] ss:$0 sm:$0xff] }
 0xdfc   : > { %2318 = vmatpush.msrb.mxu0 %v2752_v57 }
 0xdfe   : > { %v2123_v61 = vpop.f32.mrf.mxu1  ;;  %2319 = vmatpush.msrb.mxu0 %v2751_v58 }
 0xdff   : > { %v2127_v62 = vadd.f32 %v2123_v61, %v2036_v60 }
 0xe01   : > { %2748 = vmatmul.msk.f32.gmra.mxu2 %vm850_vm2, %v2127_v62 }
 0xe7c   : > { %v2161_v1 = vpop.f32.mrf.mxu2 }
 0xe7d   : > { %v2162_v5 = vadd.f32 %v2932_v0, %v2161_v1 }
 0xe7f   : > { %v2167_v3 = vadd.f32 %v2162_v5, %v4015_v46 }
 0xe81   : > { %v2173_v7 = vsel %vm850_vm2, %v2167_v3, 0.0 }
 0xe82   : > { %2174 = vadd.xlane.f32.xlu2 %v2173_v7 }
 0xe84   : > { %v2164_v8 = vpop.f32.mrf.mxu2 }
 0xe85   : > { %v2165_v11 = vadd.f32 %v2932_v0, %v2164_v8 }
 0xe87   : > { %v2168_v6 = vadd.f32 %v2165_v11, %v4024_v50  ;;  %v2231_v50 = vld [vmem:[#allocation13 + $0x38] sm:$0xff] }
 0xe88   : > { %2255 = vmatpush.msrb.mxu3 %v2231_v50  ;;  %v2936_v50 = vld [vmem:[#allocation16 + $0x1] ss:$0 sm:$0xff] }
 0xe89   : > { %v2176_v12 = vsel %vm854_vm1, %v2168_v6, 0.0 }
 0xe8a   : > { %2177 = vadd.xlane.f32.xlu0 %v2176_v12  ;;  %2256 = vmatpush.msrb.mxu3 %v2230_v19 }
 0xe8c   : > { %2257 = vmatpush.msrb.mxu3 %v2229_v20 }
 0xe8e   : > { %2258 = vmatpush.msrb.mxu3 %v2228_v21 }
 0xef5   : > { %v2175_v2 = vpop.xlane.xlu2 %2174 }
 0xef6   : > { %v2179_v13 = vmul.f32 %v2175_v2, %v3744_v18 }
 0xef8   : > { %v2181_v14 = vsub.f32 %v2167_v3, %v2179_v13 }
 0xefa   : > { %v2183_v9 = vmul.f32 %v2181_v14, %v2181_v14 }
 0xefc   : > { %v2185_v25 = vsel %vm850_vm2, %v2183_v9, 0.0 }
 0xefd   : > { %2186 = vadd.xlane.f32.xlu1 %v2185_v25  ;;  %v2178_v10 = vpop.xlane.xlu0 %2177 }
 0xefe   : > { %v2180_v46 = vmul.f32 %v2178_v10, %v3744_v18 }
 0xf00   : > { %v2182_v15 = vsub.f32 %v2168_v6, %v2180_v46 }
 0xf02   : > { %v2184_v16 = vmul.f32 %v2182_v15, %v2182_v15 }
 0xf04   : > { %v2188_v17 = vsel %vm854_vm1, %v2184_v16, 0.0 }
 0xf05   : > { %2189 = vadd.xlane.f32.xlu2 %v2188_v17 }
 0xf70   : > { %v2187_v22 = vpop.xlane.xlu1 %2186 }
 0xf71   : > { %v2191_v24 = vmul.f32 %v2187_v22, %v3744_v18 }
 0xf73   : > { %v2193_v26 = vadd.f32 1e-12, %v2191_v24 }
 0xf75   : > { %3022 = vrsqrt.f32 %v2193_v26  ;;  %vm2201_vm13 = vweird.f32 %v2193_v26 }
 0xf78   : > { %v2190_v28 = vpop.xlane.xlu2 %2189 }
 0xf79   : > { %v2192_v27 = vmul.f32 %v2190_v28, %v3744_v18 }
 0xf7b   : > { %v3023_v32 = vpop.eup %3022  ;;  %v2194_v23 = vadd.f32 1e-12, %v2192_v27 }
 0xf7c   : > { %v2196_v33 = vmul.f32 %v3023_v32, %v2193_v26  ;;  %vm2202_vm12 = vweird.f32 %v3023_v32 }
 0xf7d   : > { %3024 = vrsqrt.f32 %v2194_v23  ;;  %vm2203_vm14 = vmor %vm2201_vm13, %vm2202_vm12  ;;  %vm2211_vm6 = vweird.f32 %v2194_v23 }
 0xf7e   : > { %v2197_v34 = vmul.f32 %v3023_v32, %v2196_v33 }
 0xf80   : > { %v2198_v29 = vmul.f32 0.5, %v2197_v34 }
 0xf82   : > { %v2199_v35 = vsub.f32 1.5, %v2198_v29 }
 0xf83   : > { %v3025_v36 = vpop.eup %3024 }
 0xf84   : > { %v2200_v37 = vmul.f32 %v3023_v32, %v2199_v35  ;;  %v2206_v38 = vmul.f32 %v3025_v36, %v2194_v23  ;;  %vm2212_vm5 = vweird.f32 %v3025_v36 }
 0xf85   : > { %vm2213_vm7 = vmor %vm2211_vm6, %vm2212_vm5 }
 0xf86   : > { %v2204_v39 = vsel %vm2203_vm14, %v3023_v32, %v2200_v37  ;;  %v2207_v31 = vmul.f32 %v3025_v36, %v2206_v38 }
 0xf87   : > { %v2215_v40 = vmul.f32 %v2204_v39, %v2181_v14  ;;  %v2390_v39 = vld [vmem:[%s4220_s17 + $0x18] sm:$0xff] }
 0xf88   : > { %v2208_v42 = vmul.f32 0.5, %v2207_v31  ;;  %2413 = vmatpush.msrb.mxu1 %v2390_v39  ;;  %v2389_v31 = vld [vmem:[%s4220_s17 + $0x10] sm:$0xff] }
 0xf89   : > { %v2220_v43 = vmul.f32 %v2933_v30, %v2215_v40  ;;  %v2388_v40 = vld [vmem:[%s4220_s17 + $0x8] sm:$0xff] }
 0xf8a   : > { %v2209_v44 = vsub.f32 1.5, %v2208_v42  ;;  %2414 = vmatpush.msrb.mxu1 %v2389_v31 }
 0xf8b   : > { %v2225_v4 = vadd.f32 %v2934_v41, %v2220_v43 }
 0xf8c   : > { %v2210_v45 = vmul.f32 %v3025_v36, %v2209_v44  ;;  %2415 = vmatpush.msrb.mxu1 %v2388_v40 }
 0xf8d   : > { %2749 = vmatmul.msk.f32.vlgmr.msrb.gmra.mxu3 %vm850_vm2, %v2225_v4 }
 0xf8e   : > { %v2214_v47 = vsel %vm2213_vm7, %v3025_v36, %v2210_v45 }
 0xf8f   : > { %v2216_v63 = vmul.f32 %v2214_v47, %v2182_v15 }
 0xf91   : > { %v2221_v48 = vmul.f32 %v2933_v30, %v2216_v63 }
 0xf93   : > { %v2226_v49 = vadd.f32 %v2934_v41, %v2221_v48  ;;  %v2387_v41 = vld [vmem:[%s4220_s17] sm:$0xff] }
 0xf94   : > { %2416 = vmatpush.msrb.mxu1 %v2387_v41 }
 0xf95   : > { %2750 = vmatmul.msk.f32.gmra.mxu3 %vm850_vm2, %v2226_v49 }
0x1010   : > { %v2260_v60 = vpop.f32.mrf.mxu3 }
0x1011   : > { %v2261_v61 = vadd.f32 %v2935_v59, %v2260_v60  ;;  %v2938_v60 = vld [vmem:[#allocation19 + $0x1] ss:$0 sm:$0xff] }
0x1013   : > { %v2268_v62 = vmul.f32 0.044715, %v2261_v61  ;;  %v2266_v9 = vmul.f32 0.5, %v2261_v61 }
0x1015   : > { %v2270_v0 = vmul.f32 %v2268_v62, %v2261_v61 }
0x1017   : > { %v2272_v1 = vmul.f32 %v2270_v0, %v2261_v61 }
0x1018   : > { %v2263_v5 = vpop.f32.mrf.mxu3 }
0x1019   : > { %v2274_v3 = vadd.f32 %v2272_v1, %v2261_v61  ;;  %v2264_v7 = vadd.f32 %v2935_v59, %v2263_v5 }
0x101b   : > { %v2276_v8 = vmul.f32 0.7978846, %v2274_v3  ;;  %v2269_v11 = vmul.f32 0.044715, %v2264_v7  ;;  %v2267_v15 = vmul.f32 0.5, %v2264_v7 }
0x101d   : > { %3026 = vtanh.f32 %v2276_v8  ;;  %v2271_v6 = vmul.f32 %v2269_v11, %v2264_v7  ;;  %v2939_v11 = vld [vmem:[#allocation21] ss:$0 sm:$0xff] }
0x101f   : > { %v2273_v12 = vmul.f32 %v2271_v6, %v2264_v7 }
0x1021   : > { %v2275_v2 = vadd.f32 %v2273_v12, %v2264_v7 }
0x1023   : > { %v3027_v13 = vpop.eup %3026  ;;  %v2277_v14 = vmul.f32 0.7978846, %v2275_v2 }
0x1024   : > { %v2280_v25 = vadd.f32 1.0, %v3027_v13 }
0x1025   : > { %3028 = vtanh.f32 %v2277_v14 }
0x1026   : > { %v2282_v10 = vmul.f32 %v2280_v25, %v2266_v9 }
0x1028   : > { %2759 = vmatmul.msk.f32.vlgmr.msrb.gmra.mxu0 %vm1569_vm4, %v2282_v10 }
0x102b   : > { %v3029_v46 = vpop.eup %3028 }
0x102c   : > { %v2281_v16 = vadd.f32 1.0, %v3029_v46 }
0x102e   : > { %v2283_v17 = vmul.f32 %v2281_v16, %v2267_v15 }
0x1030   : > { %2760 = vmatmul.msk.f32.gmra.mxu0 %vm1569_vm4, %v2283_v17 }
0x10a5   : > { %v2321_v19 = vpop.f32.mrf.mxu0 }
0x10a6   : > { %v2322_v20 = vadd.f32 %v2936_v50, %v2321_v19 }
0x10a8   : > { %v2327_v21 = vadd.f32 %v2322_v20, %v2225_v4 }
0x10aa   : > { %v2333_v22 = vsel %vm850_vm2, %v2327_v21, 0.0 }
0x10ab   : > { %2334 = vadd.xlane.f32.xlu0 %v2333_v22 }
0x10ad   : > { %v2324_v24 = vpop.f32.mrf.mxu0 }
0x10ae   : > { %v2325_v26 = vadd.f32 %v2936_v50, %v2324_v24 }
0x10b0   : > { %v2328_v28 = vadd.f32 %v2325_v26, %v2226_v49 }
0x10b2   : > { %v2336_v27 = vsel %vm854_vm1, %v2328_v28, 0.0 }
0x10b3   : > { %2337 = vadd.xlane.f32.xlu1 %v2336_v27 }
0x111e   : > { %v2335_v32 = vpop.xlane.xlu0 %2334 }
0x111f   : > { %v2339_v23 = vmul.f32 %v2335_v32, %v3744_v18 }
0x1121   : > { %v2341_v33 = vsub.f32 %v2327_v21, %v2339_v23 }
0x1123   : > { %v2343_v34 = vmul.f32 %v2341_v33, %v2341_v33 }
0x1125   : > { %v2345_v29 = vsel %vm850_vm2, %v2343_v34, 0.0 }
0x1126   : > { %v2338_v35 = vpop.xlane.xlu1 %2337  ;;  %2346 = vadd.xlane.f32.xlu2 %v2345_v29 }
0x1127   : > { %v2340_v36 = vmul.f32 %v2338_v35, %v3744_v18 }
0x1129   : > { %v2342_v37 = vsub.f32 %v2328_v28, %v2340_v36 }
0x112b   : > { %v2344_v38 = vmul.f32 %v2342_v37, %v2342_v37 }
0x112d   : > { %v2348_v30 = vsel %vm854_vm1, %v2344_v38, 0.0 }
0x112e   : > { %2349 = vadd.xlane.f32.xlu0 %v2348_v30 }
0x1199   : > { %v2347_v42 = vpop.xlane.xlu2 %2346 }
0x119a   : > { %v2351_v43 = vmul.f32 %v2347_v42, %v3744_v18 }
0x119c   : > { %v2353_v44 = vadd.f32 1e-12, %v2351_v43 }
0x119e   : > { %3030 = vrsqrt.f32 %v2353_v44  ;;  %vm2361_vm8 = vweird.f32 %v2353_v44 }
0x11a1   : > { %v2350_v4 = vpop.xlane.xlu0 %2349 }
0x11a2   : > { %v2352_v45 = vmul.f32 %v2350_v4, %v3744_v18 }
0x11a4   : > { %v3031_v47 = vpop.eup %3030  ;;  %v2354_v63 = vadd.f32 1e-12, %v2352_v45 }
0x11a5   : > { %v2356_v48 = vmul.f32 %v3031_v47, %v2353_v44  ;;  %vm2362_vm1 = vweird.f32 %v3031_v47 }
0x11a6   : > { %3032 = vrsqrt.f32 %v2354_v63  ;;  %vm2363_vm4 = vmor %vm2361_vm8, %vm2362_vm1  ;;  %vm2371_vm10 = vweird.f32 %v2354_v63 }
0x11a7   : > { %v2357_v49 = vmul.f32 %v3031_v47, %v2356_v48 }
0x11a9   : > { %v2358_v51 = vmul.f32 0.5, %v2357_v49 }
0x11ab   : > { %v2359_v52 = vsub.f32 1.5, %v2358_v51 }
0x11ac   : > { %v3033_v53 = vpop.eup %3032 }
0x11ad   : > { %v2360_v54 = vmul.f32 %v3031_v47, %v2359_v52  ;;  %v2366_v55 = vmul.f32 %v3033_v53, %v2354_v63  ;;  %vm2372_vm9 = vweird.f32 %v3033_v53 }
0x11ae   : > { %vm2373_vm11 = vmor %vm2371_vm10, %vm2372_vm9 }
0x11af   : > { %v2364_v57 = vsel %vm2363_vm4, %v3031_v47, %v2360_v54  ;;  %v2367_v58 = vmul.f32 %v3033_v53, %v2366_v55 }
0x11b0   : > { %v2375_v59 = vmul.f32 %v2364_v57, %v2341_v33 }
0x11b1   : > { %v2368_v18 = vmul.f32 0.5, %v2367_v58 }
0x11b2   : > { %v2380_v61 = vmul.f32 %v2937_v56, %v2375_v59 }
0x11b3   : > { %v2369_v62 = vsub.f32 1.5, %v2368_v18 }
0x11b4   : > { %v2385_v0 = vadd.f32 %v2938_v60, %v2380_v61 }
0x11b5   : > { %v2370_v1 = vmul.f32 %v3033_v53, %v2369_v62 }
0x11b6   : > { %2761 = vmatmul.msk.f32.vlgmr.msrb.gmra.mxu1 %vm850_vm2, %v2385_v0 }
0x11b7   : > { %v2374_v5 = vsel %vm2373_vm11, %v3033_v53, %v2370_v1 }
0x11b8   : > { %v2376_v3 = vmul.f32 %v2374_v5, %v2342_v37 }
0x11ba   : > { %v2381_v7 = vmul.f32 %v2937_v56, %v2376_v3 }
0x11bc   : > { %v2386_v8 = vadd.f32 %v2938_v60, %v2381_v7 }
0x11be   : > { %2762 = vmatmul.msk.f32.gmra.mxu1 %vm850_vm2, %v2386_v8 }
0x1233   : > { %v2418_v6 = vpop.f32.mrf.mxu1 }
0x1234   : > { %v2419_v12 = vadd.f32 %v2939_v11, %v2418_v6 }
0x1236   : > { %2424 = vst [vmem:[%s811_s6] sm:$0xff] %v2419_v12 }
0x123b   : > { %v2421_v2 = vpop.f32.mrf.mxu1 }
0x123c   : > { %v2422_v13 = vadd.f32 %v2939_v11, %v2421_v2 }
0x123e   : > { %2425 = vst [vmem:[%s811_s6 + $0x8] sm:$0x1] %v2422_v13 }
0x123f PF: > { %s4256_s30 = sld [smem:[#allocation29_spill]] }
0x1245   : > { %s36_s0 = sadd.s32 1, %s4256_s30  }
0x1246   : > { %p33_p7 = scmp.ge.s32.totalorder %s36_s0, 4  }
0x1248   :  { %35 = sbr.rel (!%p33_p7) target bundleno = 16 (0x10), region = 199 }
0x124d   :  { %2447 = vsyncpa [#allocation3], 1 }
0x124e   :  { %2449 = vsyncpa [#allocation3 + $0x1], 1 }
0x124f   :  { %2450 = vsyncpa [#allocation5], 1 }
0x1250   :  { %2451 = vsyncpa [#allocation8], 1 }
0x1251   :  { %2452 = vsyncpa [#allocation11], 1 }
0x1252   :  { %2453 = vsyncpa [#allocation14], 1 }
0x1253   :  { %2454 = vsyncpa [#allocation17], 1 }
0x1254   :  { %2455 = vsyncpa [#allocation20], 1 }

</bundles_post_ra>
